<compile_context>
chip_gen: v5e
topology: v5e:2x2
jax: 0.10.0
libtpu: 0.0.40
codegen_flags: <defaults>
</compile_context>

<pallas_src>
import functools

import jax
import jax.numpy as jnp
from jax import lax
from jax.experimental import pallas as pl
from jax.experimental.pallas import tpu as pltpu


def _round_up(x, m):
    return ((x + m - 1) // m) * m


def _vmem_limit_bytes():
    """Generation-aware scoped-VMEM limit: use more of v4/v5e/v6e's 128 MiB,
    stay well under v7x's 64 MiB physical."""
    try:
        kind = jax.devices()[0].device_kind.lower()
    except Exception:
        kind = ""
    if any(g in kind for g in ("v4", "v5", "v6")):
        return 96 * 1024 * 1024
    return 48 * 1024 * 1024


def context_gate_attn_kernel(x_q_ref, x_k_ref, bias_ref, w1a_ref, w1b_ref,
                             b1_ref, w2_ref, b2_ref, out_ref, attn_ref,
                             qa_sc, kb_sc, conf_sc, *, scale, tk):
    """One (batch, query-tile) grid step.

    x_q_ref : (TQ, Dp)  query rows of this tile, input dtype
    x_k_ref : (Lk, Dp)  all keys/values (resident across q steps of a batch)
    bias_ref: (1, Lk)   additive mask bias (0 for valid keys, -inf for masked)
    w1a_ref : (Dp, Dp)  first Linear, Q-half (pre-transposed for x @ W)
    w1b_ref : (Dp, Dp)  first Linear, K-half
    b1_ref  : (1, Dp)   first Linear bias
    w2_ref  : (1, Dp)   second Linear weight (out_features = 1)
    b2_ref  : (1, 1)    second Linear bias
    out_ref : (TQ, Dp)  gated-attention output tile
    attn_ref: (TQ, Lk)  attention weights tile (f32)
    qa_sc   : (TQ, Dp)  f32 scratch: x_q @ W1a + b1
    kb_sc   : (Lk, Dp)  f32 scratch: x_k @ W1b
    conf_sc : (TQ, Lk)  f32 scratch: conflict scores for this query tile
    """
    TQ, Dp = x_q_ref.shape
    Lk = x_k_ref.shape[0]
    n_k = Lk // tk
    n_d = Dp // 128

    x_q = x_q_ref[...]                               # keep input dtype for the MXU
    x_k = x_k_ref[...]

    # conflict_proj first layer split: [Q_i ; K_j] @ W1 + b1 == (Q_i@W1a + b1) + K_j@W1b
    # Recomputed every q-step (no state carried across the grid) so both grid axes can
    # be "parallel" (megacore-safe); this MXU work overlaps the VPU-bound loop below.
    qa_sc[...] = (jnp.dot(x_q, w1a_ref[...], preferred_element_type=jnp.float32)
                  + b1_ref[...].astype(jnp.float32))
    kb_sc[...] = jnp.dot(x_k, w1b_ref[...], preferred_element_type=jnp.float32)

    w2 = w2_ref[...].astype(jnp.float32)             # (1, Dp)
    b2 = b2_ref[0, 0].astype(jnp.float32)

    def k_step(ki, carry):
        c0 = pl.multiple_of(ki * tk, tk)
        acc = jnp.full((TQ, tk), b2, jnp.float32)
        # Chunk the D reduction into 128-lane slabs: the live relu intermediate is
        # bounded at (TQ, tk, 128) regardless of D, and the weighted reduce fuses.
        for dc in range(n_d):
            d0 = dc * 128
            qa_c = qa_sc[:, pl.ds(d0, 128)]                      # (TQ, 128)
            kb_c = kb_sc[pl.ds(c0, tk), pl.ds(d0, 128)]          # (tk, 128)
            w2_c = w2[:, d0:d0 + 128]                            # (1, 128)
            h = jnp.maximum(qa_c[:, None, :] + kb_c[None, :, :], 0.0)
            acc = acc + jnp.sum(h * w2_c[None, :, :], axis=-1)
        conf_sc[:, pl.ds(c0, tk)] = acc
        return carry

    # Don't fully unroll the key loop at large n_k (code size / vreg pressure).
    lax.fori_loop(0, n_k, k_step, 0, unroll=(True if n_k <= 2 else 2))

    # Raw (unscaled) QK^T for this query tile; 1/sqrt(d) is folded into the
    # softmax exponent below (softmax(c*x) is invariant to computing it this way).
    score = lax.dot_general(x_q, x_k, (((1,), (1,)), ((), ())),
                            preferred_element_type=jnp.float32)   # (TQ, Lk)

    gate = jax.nn.sigmoid(conf_sc[...])              # EUP transcendental path
    g = score * gate + bias_ref[...]                 # additive 0/-inf key mask
    m = jnp.max(g, axis=-1, keepdims=True)
    e = jnp.exp((g - m) * jnp.float32(scale))        # scale folded into exponent
    s = jnp.sum(e, axis=-1, keepdims=True)
    inv = pl.reciprocal(s, approx=True)              # EUP seed (free slot) ...
    inv = inv * (2.0 - s * inv)                      # ... + one Newton step
    p = e * inv
    attn_ref[...] = p

    # Attention-weighted V: MXU matmul in the input dtype, f32 accumulation.
    out = jnp.dot(p.astype(x_k.dtype), x_k, preferred_element_type=jnp.float32)
    out_ref[...] = out.astype(out_ref.dtype)


@jax.jit
def local_context_encoder_forward(hidden_states, attention_mask,
                                  w1a, w1b, b1, w2, b2):
    """ContextGateAttention forward (Q = K = V = hidden_states).

    w1a/w1b are the Q-/K-halves of the conflict_proj Linear(2D->D) weight,
    pre-transposed for `x @ W`; b1: (1, D); w2: (1, D); b2: (1, 1).
    """
    B, L, D = hidden_states.shape
    TQ = 32 if L >= 32 else 8           # query tile (sublane granule; divides 128)
    TK = 128                            # key tile for the conflict-MLP inner loop
    Lq = _round_up(L, TQ)               # query rows padded only to the tile granule
    Lk = _round_up(max(L, 1), 128)      # key/lane dims padded to 128 (lane-dense)
    Dp = _round_up(D, 128)
    NQ = Lq // TQ

    dtype = hidden_states.dtype
    x_p = jnp.zeros((B, Lk, Dp), dtype).at[:, :L, :D].set(hidden_states)
    mask_i = jnp.zeros((B, Lk), jnp.int32).at[:, :L].set(
        attention_mask.astype(jnp.int32))
    # Additive mask bias (0 valid / -inf masked or padded key), hoisted out of the kernel.
    bias_p = jnp.where(mask_i == 0, -jnp.inf, 0.0).astype(jnp.float32).reshape(B, 1, Lk)
    # Zero padding keeps the math exact: padded D columns of W1a/W1b/w2 are 0,
    # padded keys get a -inf bias, padded query rows are sliced off below.
    w1a_p = jnp.zeros((Dp, Dp), dtype).at[:D, :D].set(w1a.astype(dtype))
    w1b_p = jnp.zeros((Dp, Dp), dtype).at[:D, :D].set(w1b.astype(dtype))
    b1_p = jnp.zeros((1, Dp), jnp.float32).at[:, :D].set(b1.astype(jnp.float32))
    w2_p = jnp.zeros((1, Dp), jnp.float32).at[:, :D].set(w2.astype(jnp.float32))
    b2_p = b2.astype(jnp.float32).reshape(1, 1)

    kernel = functools.partial(context_gate_attn_kernel,
                               scale=1.0 / (D ** 0.5), tk=TK)

    out_p, attn_p = pl.pallas_call(
        kernel,
        out_shape=(
            jax.ShapeDtypeStruct((B, Lq, Dp), dtype),
            jax.ShapeDtypeStruct((B, Lq, Lk), jnp.float32),
        ),
        grid=(B, NQ),
        in_specs=[
            pl.BlockSpec((None, TQ, Dp), lambda b, q: (b, q, 0)),  # x: query tile
            pl.BlockSpec((None, Lk, Dp), lambda b, q: (b, 0, 0)),  # x: keys/values (resident)
            pl.BlockSpec((None, 1, Lk), lambda b, q: (b, 0, 0)),   # additive mask bias
            pl.BlockSpec((Dp, Dp), lambda b, q: (0, 0)),           # w1a (resident)
            pl.BlockSpec((Dp, Dp), lambda b, q: (0, 0)),           # w1b (resident)
            pl.BlockSpec((1, Dp), lambda b, q: (0, 0)),            # b1
            pl.BlockSpec((1, Dp), lambda b, q: (0, 0)),            # w2
            pl.BlockSpec((1, 1), lambda b, q: (0, 0)),             # b2
        ],
        out_specs=(
            pl.BlockSpec((None, TQ, Dp), lambda b, q: (b, q, 0)),
            pl.BlockSpec((None, TQ, Lk), lambda b, q: (b, q, 0)),
        ),
        scratch_shapes=[
            pltpu.VMEM((TQ, Dp), jnp.float32),   # qa = x_q@W1a + b1
            pltpu.VMEM((Lk, Dp), jnp.float32),   # kb = x_k@W1b
            pltpu.VMEM((TQ, Lk), jnp.float32),   # conflict scores of this query tile
        ],
        compiler_params=pltpu.CompilerParams(
            dimension_semantics=("parallel", "parallel"),  # megacore: batch + query tiles
            vmem_limit_bytes=_vmem_limit_bytes()),
    )(x_p, x_p, bias_p, w1a_p, w1b_p, b1_p, w2_p, b2_p)

    return out_p[:, :L, :D], attn_p[:, :L, :L], attention_mask


def reference_forward(hidden_states, attention_mask, w1a, w1b, b1, w2, b2):
    """Pure-JAX reference mirroring the PyTorch ContextGateAttention math."""
    B, L, D = hidden_states.shape
    q = k = v = hidden_states.astype(jnp.float32)
    attn_score = jnp.einsum('bld,bmd->blm', q, k) / (D ** 0.5)
    qe = jnp.broadcast_to(q[:, :, None, :], (B, L, L, D))
    ke = jnp.broadcast_to(k[:, None, :, :], (B, L, L, D))
    h = jax.nn.relu(jnp.einsum('blmd,de->blme', qe, w1a)
                    + jnp.einsum('blmd,de->blme', ke, w1b) + b1[0])
    conflict = jnp.einsum('blmd,d->blm', h, w2[0]) + b2[0, 0]
    gated = attn_score * jax.nn.sigmoid(conflict)
    mask2d = jnp.broadcast_to(attention_mask[:, None, :], (B, L, L))
    gated = jnp.where(mask2d == 0, -jnp.inf, gated)
    attn_w = jax.nn.softmax(gated, axis=-1)
    out = jnp.einsum('blm,bmd->bld', attn_w, v)
    return out, attn_w


if __name__ == "__main__":
    B, L, D = 2, 8, 32   # small synthetic shapes: batch=2, seq=8, hidden=32

    key = jax.random.PRNGKey(0)
    k_hs, k_w1a, k_w1b, k_b1, k_w2 = jax.random.split(key, 5)

    # Synthetic "BERT last_hidden_state".
    hidden_states = jax.random.normal(k_hs, (B, L, D), dtype=jnp.float32)

    # Padding mask: second example has 3 padded tokens.
    attention_mask = jnp.array(
        [[1] * L, [1] * (L - 3) + [0] * 3], dtype=jnp.int32)

    # conflict_proj parameters:
    #   Linear(2D -> D): weight (D, 2D) split into Q-half / K-half and transposed.
    #   Linear(D -> 1) : weight (1, D), bias (1, 1).
    w1a = 0.05 * jax.random.normal(k_w1a, (D, D), dtype=jnp.float32)
    w1b = 0.05 * jax.random.normal(k_w1b, (D, D), dtype=jnp.float32)
    b1 = 0.05 * jax.random.normal(k_b1, (1, D), dtype=jnp.float32)
    w2 = 0.05 * jax.random.normal(k_w2, (1, D), dtype=jnp.float32)
    b2 = jnp.zeros((1, 1), dtype=jnp.float32)

    out, attn_w, mask_out = local_context_encoder_forward(
        hidden_states, attention_mask, w1a, w1b, b1, w2, b2)
    jax.block_until_ready((out, attn_w, mask_out))

    # Correctness check against the pure-JAX reference (small headroom for
    # MXU accumulation-order / approx-reciprocal / scale-fold differences).
    # NOTE: rows whose attention_mask is all zero produce NaN in both the kernel
    # and the reference (softmax over an all -inf row), matching PyTorch.
    ref_out, ref_attn = reference_forward(
        hidden_states, attention_mask, w1a, w1b, b1, w2, b2)
    assert out.shape == (B, L, D) and attn_w.shape == (B, L, L)
    assert jnp.allclose(out, ref_out, atol=1e-4, rtol=1e-4)
    assert jnp.allclose(attn_w, ref_attn, atol=1e-4, rtol=1e-4)

    print("KERNEL_OK")
</pallas_src>

<mosaic_0001>
module attributes {stable_mosaic.version = 11 : i64} {
  func.func @context_gate_attn_kernel(%arg0: i32, %arg1: i32, %arg2: memref<1x8x128xf32, #tpu.memory_space<vmem>>, %arg3: memref<1x128x128xf32, #tpu.memory_space<vmem>>, %arg4: memref<1x1x128xf32, #tpu.memory_space<vmem>>, %arg5: memref<128x128xf32, #tpu.memory_space<vmem>>, %arg6: memref<128x128xf32, #tpu.memory_space<vmem>>, %arg7: memref<1x128xf32, #tpu.memory_space<vmem>>, %arg8: memref<1x128xf32, #tpu.memory_space<vmem>>, %arg9: memref<1x1xf32, #tpu.memory_space<vmem>>, %arg10: memref<1x8x128xf32, #tpu.memory_space<vmem>>, %arg11: memref<1x8x128xf32, #tpu.memory_space<vmem>>, %arg12: memref<8x128xf32, #tpu.memory_space<vmem>>, %arg13: memref<128x128xf32, #tpu.memory_space<vmem>>, %arg14: memref<8x128xf32, #tpu.memory_space<vmem>>) attributes {dimension_semantics = [#tpu.dimension_semantics<parallel>, #tpu.dimension_semantics<parallel>], iteration_bounds = array<i64: 2, 1>, scalar_prefetch = 0 : i64, scratch_operands = 3 : i64, tpu.core_type = #tpu.core_type<tc>, window_params = [{transform_indices = @transform_0, window_bounds = array<i64: 1, 8, 128>}, {transform_indices = @transform_1, window_bounds = array<i64: 1, 128, 128>}, {transform_indices = @transform_2, window_bounds = array<i64: 1, 1, 128>}, {pipeline_mode = #tpu.pipeline_mode<synchronous>, transform_indices = @transform_3, window_bounds = array<i64: 128, 128>}, {pipeline_mode = #tpu.pipeline_mode<synchronous>, transform_indices = @transform_4, window_bounds = array<i64: 128, 128>}, {pipeline_mode = #tpu.pipeline_mode<synchronous>, transform_indices = @transform_5, window_bounds = array<i64: 1, 128>}, {pipeline_mode = #tpu.pipeline_mode<synchronous>, transform_indices = @transform_6, window_bounds = array<i64: 1, 128>}, {pipeline_mode = #tpu.pipeline_mode<synchronous>, transform_indices = @transform_7, window_bounds = array<i64: 1, 1>}, {transform_indices = @transform_8, window_bounds = array<i64: 1, 8, 128>}, {transform_indices = @transform_9, window_bounds = array<i64: 1, 8, 128>}]} {
    %c0 = arith.constant 0 : index
    %c0_0 = arith.constant 0 : index
    %c0_1 = arith.constant 0 : index
    %0 = vector.load %arg2[%c0, %c0_0, %c0_1] : memref<1x8x128xf32, #tpu.memory_space<vmem>>, vector<1x8x128xf32>
    %1 = vector.shape_cast %0 : vector<1x8x128xf32> to vector<8x128xf32>
    %c0_2 = arith.constant 0 : index
    %c0_3 = arith.constant 0 : index
    %c0_4 = arith.constant 0 : index
    %2 = vector.load %arg3[%c0_2, %c0_3, %c0_4] : memref<1x128x128xf32, #tpu.memory_space<vmem>>, vector<1x128x128xf32>
    %3 = vector.shape_cast %2 : vector<1x128x128xf32> to vector<128x128xf32>
    %c0_5 = arith.constant 0 : index
    %c0_6 = arith.constant 0 : index
    %4 = vector.load %arg5[%c0_5, %c0_6] : memref<128x128xf32, #tpu.memory_space<vmem>>, vector<128x128xf32>
    %cst = arith.constant dense<0.000000e+00> : vector<8x128xf32>
    %5 = tpu.matmul %1, %4, %cst {dimension_numbers = #tpu.dot_dimension_numbers<[1], [0], [0], [1], [0, 0, 1, 1], [], []>} : vector<8x128xf32>, vector<128x128xf32>, vector<8x128xf32> -> vector<8x128xf32>
    %c0_7 = arith.constant 0 : index
    %c0_8 = arith.constant 0 : index
    %6 = vector.load %arg7[%c0_7, %c0_8] : memref<1x128xf32, #tpu.memory_space<vmem>>, vector<1x128xf32>
    %7 = vector.broadcast %6 : vector<1x128xf32> to vector<8x128xf32>
    %8 = arith.addf %5, %7 : vector<8x128xf32>
    %c0_9 = arith.constant 0 : index
    %c0_10 = arith.constant 0 : index
    %9 = vector.load %arg12[%c0_9, %c0_10] : memref<8x128xf32, #tpu.memory_space<vmem>>, vector<8x128xf32>
    tpu.vector_store %arg12[%c0_9, %c0_10], %8 {strides = array<i32>} : memref<8x128xf32, #tpu.memory_space<vmem>>, vector<8x128xf32>,
    %c0_11 = arith.constant 0 : index
    %c0_12 = arith.constant 0 : index
    %10 = vector.load %arg6[%c0_11, %c0_12] : memref<128x128xf32, #tpu.memory_space<vmem>>, vector<128x128xf32>
    %cst_13 = arith.constant dense<0.000000e+00> : vector<128x128xf32>
    %11 = tpu.matmul %3, %10, %cst_13 {dimension_numbers = #tpu.dot_dimension_numbers<[1], [0], [0], [1], [0, 0, 1, 1], [], []>} : vector<128x128xf32>, vector<128x128xf32>, vector<128x128xf32> -> vector<128x128xf32>
    %c0_14 = arith.constant 0 : index
    %c0_15 = arith.constant 0 : index
    %12 = vector.load %arg13[%c0_14, %c0_15] : memref<128x128xf32, #tpu.memory_space<vmem>>, vector<128x128xf32>
    tpu.vector_store %arg13[%c0_14, %c0_15], %11 {strides = array<i32>} : memref<128x128xf32, #tpu.memory_space<vmem>>, vector<128x128xf32>,
    %c0_16 = arith.constant 0 : index
    %c0_17 = arith.constant 0 : index
    %13 = vector.load %arg8[%c0_16, %c0_17] : memref<1x128xf32, #tpu.memory_space<vmem>>, vector<1x128xf32>
    %c0_18 = arith.constant 0 : index
    %c0_19 = arith.constant 0 : index
    %14 = vector.load %arg9[%c0_18, %c0_19] : memref<1x1xf32, #tpu.memory_space<vmem>>, vector<1x1xf32>
    %15 = vector.extract %14[0, 0] : f32 from vector<1x1xf32>
    %c0_i32 = arith.constant 0 : i32
    %c128_i32 = arith.constant 128 : i32
    %16 = arith.muli %c0_i32, %c128_i32 : i32
    %17 = tpu.assume_multiple %16, 128 : i32
    %18 = vector.broadcast %15 : f32 to vector<8x128xf32>
    %c0_20 = arith.constant 0 : index
    %c0_21 = arith.constant 0 : index
    %19 = vector.load %arg12[%c0_20, %c0_21] : memref<8x128xf32, #tpu.memory_space<vmem>>, vector<8x128xf32>
    %20 = arith.index_cast %17 : i32 to index
    %c0_22 = arith.constant 0 : index
    %21 = vector.load %arg13[%20, %c0_22] : memref<128x128xf32, #tpu.memory_space<vmem>>, vector<128x128xf32>
    %22 = vector.shape_cast %19 : vector<8x128xf32> to vector<8x1x128xf32>
    %23 = vector.shape_cast %21 : vector<128x128xf32> to vector<1x128x128xf32>
    %24 = vector.broadcast %22 : vector<8x1x128xf32> to vector<8x128x128xf32>
    %25 = vector.broadcast %23 : vector<1x128x128xf32> to vector<8x128x128xf32>
    %26 = arith.addf %24, %25 : vector<8x128x128xf32>
    %cst_23 = arith.constant 0.000000e+00 : f32
    %27 = vector.broadcast %cst_23 : f32 to vector<8x128x128xf32>
    %28 = arith.maximumf %26, %27 : vector<8x128x128xf32>
    %29 = vector.shape_cast %13 : vector<1x128xf32> to vector<1x1x128xf32>
    %30 = vector.broadcast %29 : vector<1x1x128xf32> to vector<8x128x128xf32>
    %31 = arith.mulf %28, %30 : vector<8x128x128xf32>
    %cst_24 = arith.constant dense<0.000000e+00> : vector<8x128xf32>
    %32 = vector.multi_reduction <add>, %31, %cst_24 [2] : vector<8x128x128xf32> to vector<8x128xf32>
    %33 = arith.addf %18, %32 : vector<8x128xf32>
    %c0_25 = arith.constant 0 : index
    %34 = arith.index_cast %17 : i32 to index
    %35 = vector.load %arg14[%c0_25, %34] : memref<8x128xf32, #tpu.memory_space<vmem>>, vector<8x128xf32>
    tpu.vector_store %arg14[%c0_25, %34], %33 {strides = array<i32>} : memref<8x128xf32, #tpu.memory_space<vmem>>, vector<8x128xf32>,
    %c1_i32 = arith.constant 1 : i32
    %cst_26 = arith.constant dense<0.000000e+00> : vector<8x128xf32>
    %36 = tpu.matmul %1, %3, %cst_26 {dimension_numbers = #tpu.dot_dimension_numbers<[1], [1], [0], [0], [0, 0, 1, 0], [], []>} : vector<8x128xf32>, vector<128x128xf32>, vector<8x128xf32> -> vector<8x128xf32>
    %c0_27 = arith.constant 0 : index
    %c0_28 = arith.constant 0 : index
    %37 = vector.load %arg14[%c0_27, %c0_28] : memref<8x128xf32, #tpu.memory_space<vmem>>, vector<8x128xf32>
    %38 = arith.negf %37 : vector<8x128xf32>
    %39 = math.exp %38 : vector<8x128xf32>
    %cst_29 = arith.constant 1.000000e+00 : f32
    %40 = vector.broadcast %cst_29 : f32 to vector<8x128xf32>
    %41 = arith.addf %40, %39 : vector<8x128xf32>
    %42 = arith.divf %40, %41 : vector<8x128xf32>
    %43 = arith.mulf %36, %42 : vector<8x128xf32>
    %c0_30 = arith.constant 0 : index
    %c0_31 = arith.constant 0 : index
    %c0_32 = arith.constant 0 : index
    %44 = vector.load %arg4[%c0_30, %c0_31, %c0_32] : memref<1x1x128xf32, #tpu.memory_space<vmem>>, vector<1x1x128xf32>
    %45 = vector.shape_cast %44 : vector<1x1x128xf32> to vector<1x128xf32>
    %46 = vector.broadcast %45 : vector<1x128xf32> to vector<8x128xf32>
    %47 = arith.addf %43, %46 : vector<8x128xf32>
    %cst_33 = arith.constant dense<0xFF800000> : vector<8xf32>
    %48 = vector.multi_reduction <maximumf>, %47, %cst_33 [1] : vector<8x128xf32> to vector<8xf32>
    %49 = vector.shape_cast %48 : vector<8xf32> to vector<8x1xf32>
    %50 = vector.broadcast %49 : vector<8x1xf32> to vector<8x128xf32>
    %51 = arith.subf %47, %50 : vector<8x128xf32>
    %cst_34 = arith.constant 0.176776692 : f32
    %52 = vector.broadcast %cst_34 : f32 to vector<8x128xf32>
    %53 = arith.mulf %51, %52 : vector<8x128xf32>
    %54 = math.exp %53 : vector<8x128xf32>
    %cst_35 = arith.constant dense<0.000000e+00> : vector<8xf32>
    %55 = vector.multi_reduction <add>, %54, %cst_35 [1] : vector<8x128xf32> to vector<8xf32>
    %56 = vector.shape_cast %55 : vector<8xf32> to vector<8x1xf32>
    %57 = tpu.reciprocal %56 {approx = true} : vector<8x1xf32> -> vector<8x1xf32>
    %58 = arith.mulf %56, %57 : vector<8x1xf32>
    %cst_36 = arith.constant 2.000000e+00 : f32
    %59 = vector.broadcast %cst_36 : f32 to vector<8x1xf32>
    %60 = arith.subf %59, %58 : vector<8x1xf32>
    %61 = arith.mulf %57, %60 : vector<8x1xf32>
    %62 = vector.broadcast %61 : vector<8x1xf32> to vector<8x128xf32>
    %63 = arith.mulf %54, %62 : vector<8x128xf32>
    %c0_37 = arith.constant 0 : index
    %c0_38 = arith.constant 0 : index
    %c0_39 = arith.constant 0 : index
    %64 = vector.load %arg11[%c0_37, %c0_38, %c0_39] : memref<1x8x128xf32, #tpu.memory_space<vmem>>, vector<1x8x128xf32>
    %65 = vector.shape_cast %64 : vector<1x8x128xf32> to vector<8x128xf32>
    %66 = vector.shape_cast %63 : vector<8x128xf32> to vector<1x8x128xf32>
    tpu.vector_store %arg11[%c0_37, %c0_38, %c0_39], %66 {strides = array<i32>} : memref<1x8x128xf32, #tpu.memory_space<vmem>>, vector<1x8x128xf32>,
    %cst_40 = arith.constant dense<0.000000e+00> : vector<8x128xf32>
    %67 = tpu.matmul %63, %3, %cst_40 {dimension_numbers = #tpu.dot_dimension_numbers<[1], [0], [0], [1], [0, 0, 1, 1], [], []>} : vector<8x128xf32>, vector<128x128xf32>, vector<8x128xf32> -> vector<8x128xf32>
    %c0_41 = arith.constant 0 : index
    %c0_42 = arith.constant 0 : index
    %c0_43 = arith.constant 0 : index
    %68 = vector.load %arg10[%c0_41, %c0_42, %c0_43] : memref<1x8x128xf32, #tpu.memory_space<vmem>>, vector<1x8x128xf32>
    %69 = vector.shape_cast %68 : vector<1x8x128xf32> to vector<8x128xf32>
    %70 = vector.shape_cast %67 : vector<8x128xf32> to vector<1x8x128xf32>
    tpu.vector_store %arg10[%c0_41, %c0_42, %c0_43], %70 {strides = array<i32>} : memref<1x8x128xf32, #tpu.memory_space<vmem>>, vector<1x8x128xf32>,
    return
  }
  func.func @transform_0(%arg0: i32, %arg1: i32) -> (i32, i32, i32) {
    %c0_i32 = arith.constant 0 : i32
    %c0_i32_0 = arith.constant 0 : i32
    return %arg0, %arg1, %c0_i32 : i32, i32, i32
  }
  func.func @transform_1(%arg0: i32, %arg1: i32) -> (i32, i32, i32) {
    %c0_i32 = arith.constant 0 : i32
    %c0_i32_0 = arith.constant 0 : i32
    %c0_i32_1 = arith.constant 0 : i32
    return %arg0, %c0_i32, %c0_i32_0 : i32, i32, i32
  }
  func.func @transform_2(%arg0: i32, %arg1: i32) -> (i32, i32, i32) {
    %c0_i32 = arith.constant 0 : i32
    %c0_i32_0 = arith.constant 0 : i32
    %c0_i32_1 = arith.constant 0 : i32
    return %arg0, %c0_i32, %c0_i32_0 : i32, i32, i32
  }
  func.func @transform_3(%arg0: i32, %arg1: i32) -> (i32, i32) {
    %c0_i32 = arith.constant 0 : i32
    %c0_i32_0 = arith.constant 0 : i32
    %c0_i32_1 = arith.constant 0 : i32
    return %c0_i32, %c0_i32_0 : i32, i32
  }
  func.func @transform_4(%arg0: i32, %arg1: i32) -> (i32, i32) {
    %c0_i32 = arith.constant 0 : i32
    %c0_i32_0 = arith.constant 0 : i32
    %c0_i32_1 = arith.constant 0 : i32
    return %c0_i32, %c0_i32_0 : i32, i32
  }
  func.func @transform_5(%arg0: i32, %arg1: i32) -> (i32, i32) {
    %c0_i32 = arith.constant 0 : i32
    %c0_i32_0 = arith.constant 0 : i32
    %c0_i32_1 = arith.constant 0 : i32
    return %c0_i32, %c0_i32_0 : i32, i32
  }
  func.func @transform_6(%arg0: i32, %arg1: i32) -> (i32, i32) {
    %c0_i32 = arith.constant 0 : i32
    %c0_i32_0 = arith.constant 0 : i32
    %c0_i32_1 = arith.constant 0 : i32
    return %c0_i32, %c0_i32_0 : i32, i32
  }
  func.func @transform_7(%arg0: i32, %arg1: i32) -> (i32, i32) {
    %c0_i32 = arith.constant 0 : i32
    %c0_i32_0 = arith.constant 0 : i32
    %c0_i32_1 = arith.constant 0 : i32
    return %c0_i32, %c0_i32_0 : i32, i32
  }
  func.func @transform_8(%arg0: i32, %arg1: i32) -> (i32, i32, i32) {
    %c0_i32 = arith.constant 0 : i32
    %c0_i32_0 = arith.constant 0 : i32
    return %arg0, %arg1, %c0_i32 : i32, i32, i32
  }
  func.func @transform_9(%arg0: i32, %arg1: i32) -> (i32, i32, i32) {
    %c0_i32 = arith.constant 0 : i32
    %c0_i32_0 = arith.constant 0 : i32
    return %arg0, %arg1, %c0_i32 : i32, i32, i32
  }
}

</mosaic_0001>

<bundles_post_ra>
// kernel: local_context_encoder_forward.1
= control target key start
LH: loop header
LB: loop body
LE: loop exit
PB: predicated region body
PF: predicated region fallthrough
CT: control target
= control target key end

     0   :  { %s3766_s0 = inlined_call_operand.vmem [shape: f32[2,128,128], index: 0, kind: input, shape index: {}, may-alias: {0,1}]   ;;  %s3767_s1 = inlined_call_operand.vmem [shape: f32[2,128,128], index: 1, kind: input, shape index: {}, may-alias: {0,1}]   ;;  %s3768_s2 = inlined_call_operand.vmem [shape: f32[2,1,128], index: 2, kind: input, shape index: {}]   ;;  %s3769_s3 = inlined_call_operand.vmem [shape: f32[128,128], index: 3, kind: input, shape index: {}]   ;;  %s3770_s4 = inlined_call_operand.vmem [shape: f32[128,128], index: 4, kind: input, shape index: {}]   ;;  %s3771_s5 = inlined_call_operand.vmem [shape: f32[1,128], index: 5, kind: input, shape index: {}]   ;;  %s3772_s6 = inlined_call_operand.vmem [shape: f32[1,128], index: 6, kind: input, shape index: {}]   ;;  %s3773_s7 = inlined_call_operand.<no memory space> [shape: f32[1,1], index: 7, kind: input, shape index: {}]   ;;  %s3774_s8 = inlined_call_operand.hbm [shape: f32[2,8,128], index: 8, kind: output, shape index: {0}]   ;;  %s3775_s9 = inlined_call_operand.hbm [shape: f32[2,8,128], index: 9, kind: output, shape index: {1}]  }
   0x1   :  { %3784 = sst [smem:[#allocation30_spill]] %s3766_s0  ;;  %v15_v0 = vstv %s3773_s7 }
   0x2   :  { %3785 = sst [smem:[#allocation31_spill]] %s3767_s1  ;;  %16 = vst [vmem:[#allocation5] sm:$0x1] %v15_v0 }
   0x3   :  { %3786 = sst [smem:[#allocation32_spill]] %s3768_s2 }
   0x4   :  { %3787 = sst [smem:[#allocation33_spill]] %s3769_s3 }
   0x5   :  { %17 = vsyncpa [#allocation7], 0 }
   0x6   :  { %19 = vsyncpa [#allocation7 + $0x1], 0 }
   0x7   :  { %20 = vsyncpa [#allocation9], 0 }
   0x8   :  { %22 = vsyncpa [#allocation9 + $0x1], 0  ;;  %s2338_s11 = smov 0   ;;  %s2340_s12 = smov 0  }
   0x9   :  { %s2342_s13 = smov 0   ;;  %s2344_s14 = smov 0  }
   0xa   :  { %s2346_s15 = smov 0   ;;  %s2348_s16 = smov 0  }
   0xb LB: > { %s2047_s7 = sadd.s32 4294967295, %s2283_s16   ;;  %s2048_s17 = sadd.s32 4294967294, %s2283_s16   ;;  %s2283_s16 = sphi %s2348_s16, %s28_s16   ;;  %s2279_s15 = sphi %s2346_s15, %s3834_s15   ;;  %s2275_s14 = sphi %s2344_s14, %s3833_s14   ;;  %s2271_s13 = sphi %s2342_s13, %s3832_s13   ;;  %s2267_s12 = sphi %s2340_s12, %s3831_s12   ;;  %s2263_s11 = sphi %s2338_s11, %s3830_s11  }
   0xc   : > { %s40_s18 = sadd.s32 1, %s2279_s15  ;;  %s234_s19 = sadd.s32 1, %s2271_s13 }
   0xd   : > { %p42_p0 = scmp.ge.s32.totalorder %s40_s18, 2  ;;  %p244_p1 = scmp.ne.s32.totalorder %s2271_s13, %s2267_s12 }
   0xe   : > { %p245_p2 = scmp.eq.s32.totalorder %s2047_s7, 1  ;;  %p250_p3 = scmp.ne.s32.totalorder %s2267_s12, %s2263_s11 }
   0xf   : > { %s3836_s18 = smov (%p42_p0, %s40_s18), 0  ;;  %p251_p5 = scmp.eq.s32.totalorder %s2048_s17, 1 }
  0x10   : > { %p2378_p4 = por %p245_p2, %p244_p1  ;;  %s229_s21 = ssub.s32 %s2279_s15, %s3836_s18 }
  0x11   : > { %p2051_p6 = scmp.ge.s32.totalorder %s2283_s16, 1  ;;  %p232_p7 = scmp.eq.s32.totalorder %s229_s21, 0 }
  0x12   : > { %p2385_p8 = por %p251_p5, %p250_p3  ;;  %p337_p9 = scmp.lt.s32.totalorder %s2283_s16, 3 }
  0x13   : > { %s2391_s23 = scalar_select %p232_p7, %s2271_s13, %s234_s19  }
  0x14   : > { %p338_p10 = pnand %p2051_p6, %p337_p9 }
  0x16   : > { %341 = sbr.rel (%p338_p10) target bundleno = 1099 (0x44b), region = 52 }
  0x1b   : > { %s3790_s3 = sld [smem:[#allocation33_spill]]  ;;  %v2399_v2 = vld [vmem:[%s3770_s4 + $0x78] sm:$0xff]  ;;  %v2408_v4 = vld [vmem:[%s3770_s4 + $0x70] sm:$0xff]  ;;  %v2417_v6 = vld [vmem:[%s3770_s4 + $0x68] sm:$0xff]  ;;  %p389_p11 = scmp.lt.s32.totalorder %s2275_s14, 1  ;;  %vm1509_vm0 = vcmask 130112  }
  0x1c   : > { %2067 = vmatpush.msra.mxu1 %v2399_v2  ;;  %2068 = vmatpush.msra.mxu3 %v2399_v2  ;;  %v2427_v8 = vld [vmem:[%s3770_s4 + $0x60] sm:$0xff]  ;;  %v2437_v10 = vld [vmem:[%s3770_s4 + $0x58] sm:$0xff]  ;;  %v2447_v12 = vld [vmem:[%s3770_s4 + $0x50] sm:$0xff]  ;;  %s3791_s0 = sld [smem:[#allocation30_spill]]  ;;  %vm1513_vm1 = vcmask 195712   ;;  %vm1517_vm2 = vcmask 261312  }
  0x1d   : > { %v2457_v14 = vld [vmem:[%s3770_s4 + $0x48] sm:$0xff]  ;;  %v2467_v16 = vld [vmem:[%s3770_s4 + $0x40] sm:$0xff]  ;;  %v2477_v18 = vld [vmem:[%s3770_s4 + $0x38] sm:$0xff]  ;;  %s2502_s7 = scalar_select %p389_p11, %s2275_s14, 1  ;;  %vm1521_vm3 = vcmask 326912   ;;  %vm1525_vm4 = vcmask 392512  }
  0x1e   : > { %2069 = vmatpush.msra.mxu1 %v2408_v4  ;;  %2070 = vmatpush.msra.mxu3 %v2408_v4  ;;  %v2488_v20 = vld [vmem:[%s3770_s4 + $0x30] sm:$0xff]  ;;  %v2498_v22 = vld [vmem:[%s3770_s4 + $0x28] sm:$0xff]  ;;  %v2511_v24 = vld [vmem:[%s3770_s4 + $0x20] sm:$0xff]  ;;  %s3792_s1 = sld [smem:[#allocation31_spill]]  ;;  %vm1529_vm5 = vcmask 458112   ;;  %vm1533_vm6 = vcmask 523712  }
  0x1f   : > { %v2521_v26 = vld [vmem:[%s3770_s4 + $0x18] sm:$0xff]  ;;  %s2065_s29 = sshll.u32 %s2502_s7, 7  ;;  %v2532_v28 = vld [vmem:[%s3770_s4 + $0x10] sm:$0xff]  ;;  %v464_v30 = vld [vmem:[%s3770_s4 + $0x8] sm:$0xff]  ;;  %vm1537_vm7 = vcmask 589312   ;;  %vm1541_vm8 = vcmask 654912  }
  0x20   : > { %2071 = vmatpush.msra.mxu1 %v2417_v6  ;;  %2072 = vmatpush.msra.mxu3 %v2417_v6  ;;  %v463_v32 = vld [vmem:[%s3770_s4] sm:$0xff]  ;;  %vm1545_vm9 = vcmask 720512   ;;  %vm1549_vm10 = vcmask 786112   ;;  %vm1553_vm11 = vcmask 851712   ;;  %vm1557_vm12 = vcmask 917312   ;;  %s3829_s2 = sld [smem:[#allocation32_spill]] }
  0x21   : > { %v437_v1 = vld [vmem:[%s3790_s3 + $0x78] sm:$0xff]  ;;  %v436_v3 = vld [vmem:[%s3790_s3 + $0x70] sm:$0xff]  ;;  %v435_v5 = vld [vmem:[%s3790_s3 + $0x68] sm:$0xff]  ;;  %vm1561_vm13 = vcmask 982912   ;;  %vm1565_vm14 = vcmask 1048512   ;;  %vm1784_vm15 = vcmask 1041409  }
  0x22   : > { %442 = vmatpush.msra.mxu0 %v437_v1  ;;  %v434_v7 = vld [vmem:[%s3790_s3 + $0x60] sm:$0xff]  ;;  %v433_v9 = vld [vmem:[%s3790_s3 + $0x58] sm:$0xff]  ;;  %2073 = vmatpush.msra.mxu1 %v2427_v8  ;;  %v432_v11 = vld [vmem:[%s3790_s3 + $0x50] sm:$0xff]  ;;  %s396_s30 = scalar_lea.vmem %s3791_s0, %s2065_s29  ;;  %s3712_s27 = sand.u32 1, %s2267_s12  }
  0x23   : > { %2074 = vmatpush.msra.mxu3 %v2427_v8  ;;  %v431_v13 = vld [vmem:[%s3790_s3 + $0x48] sm:$0xff]  ;;  %v430_v15 = vld [vmem:[%s3790_s3 + $0x40] sm:$0xff]  ;;  %v429_v17 = vld [vmem:[%s3790_s3 + $0x38] sm:$0xff] }
  0x24   : > { %443 = vmatpush.msra.mxu0 %v436_v3  ;;  %2075 = vmatpush.msra.mxu1 %v2437_v10  ;;  %v428_v19 = vld [vmem:[%s3790_s3 + $0x30] sm:$0xff]  ;;  %v427_v21 = vld [vmem:[%s3790_s3 + $0x28] sm:$0xff]  ;;  %v426_v23 = vld [vmem:[%s3790_s3 + $0x20] sm:$0xff]  ;;  %s2549_s19 = scalar_lea.vmem %s3792_s1, %s2065_s29 }
  0x25   : > { %2076 = vmatpush.msra.mxu3 %v2437_v10  ;;  %v425_v25 = vld [vmem:[%s3790_s3 + $0x18] sm:$0xff]  ;;  %v424_v27 = vld [vmem:[%s3790_s3 + $0x10] sm:$0xff]  ;;  %v423_v29 = vld [vmem:[%s3790_s3 + $0x8] sm:$0xff] }
  0x26   : > { %444 = vmatpush.msra.mxu0 %v435_v5  ;;  %2077 = vmatpush.msra.mxu1 %v2447_v12  ;;  %v422_v31 = vld [vmem:[%s3790_s3] sm:$0xff]  ;;  %v2561_v34 = vld [vmem:[%s2549_s19 + $0x18] sm:$0xff]  ;;  %v416_v35 = vld [vmem:[%s2549_s19 + $0x50] sm:$0xff]  ;;  %s404_s25 = scalar_lea.vmem %s3829_s2, %s2502_s7  ;;  %s2052_s7 = sshll.u32 %s3712_s27, 3 }
  0x27   : > { %2078 = vmatpush.msra.mxu3 %v2447_v12  ;;  %v2558_v33 = vld [vmem:[%s396_s30] sm:$0xff]  ;;  %v417_v37 = vld [vmem:[%s2549_s19 + $0x58] sm:$0xff]  ;;  %v420_v39 = vld [vmem:[%s2549_s19 + $0x70] sm:$0xff]  ;;  %s388_s28 = scalar_lea.vmem [#allocation8], %s2052_s7  ;;  %s2061_s30 = sshll.u32 %s2275_s14, 3 }
  0x28   : > { %445 = vmatpush.msra.mxu0 %v434_v7  ;;  %2079 = vmatpush.msra.mxu1 %v2457_v14  ;;  %v2570_v36 = vld [vmem:[%s2549_s19 + $0x20] sm:$0xff]  ;;  %v421_v38 = vld [vmem:[%s2549_s19 + $0x78] sm:$0xff]  ;;  %v411_v40 = vld [vmem:[%s2549_s19 + $0x28] sm:$0xff]  ;;  %s1915_s21 = sshll.u32 %s388_s28, 4  ;;  %s2193_s14 = scalar_lea.hbm %s3775_s9, 16  ;;  %s1916_s21 = int_to_ptr.vmem [resolvable:$true] %s1915_s21 }
  0x29   : > { %2080 = vmatpush.msra.mxu3 %v2457_v14  ;;  %1800 = vmatpush.xpose.msra.mxu2 %v421_v38  ;;  %v419_v41 = vld [vmem:[%s2549_s19 + $0x68] sm:$0xff]  ;;  %v418_v42 = vld [vmem:[%s2549_s19 + $0x60] sm:$0xff]  ;;  %v412_v43 = vld [vmem:[%s2549_s19 + $0x30] sm:$0xff] }
  0x2a   : > { %446 = vmatpush.msra.mxu0 %v433_v9  ;;  %2081 = vmatpush.msra.mxu1 %v2467_v16  ;;  %v415_v44 = vld [vmem:[%s2549_s19 + $0x48] sm:$0xff]  ;;  %v414_v45 = vld [vmem:[%s2549_s19 + $0x40] sm:$0xff]  ;;  %v413_v47 = vld [vmem:[%s2549_s19 + $0x38] sm:$0xff] }
  0x2b   : > { %2082 = vmatpush.msra.mxu3 %v2467_v16  ;;  %v406_v46 = vld [vmem:[%s2549_s19] sm:$0xff]  ;;  %v407_v48 = vld [vmem:[%s2549_s19 + $0x8] sm:$0xff]  ;;  %v408_v49 = vld [vmem:[%s2549_s19 + $0x10] sm:$0xff]  ;;  %s1913_s19 = scalar_lea.hbm %s3775_s9, %s2061_s30 }
  0x2c   : > { %447 = vmatpush.msra.mxu0 %v432_v11  ;;  %2083 = vmatpush.msra.mxu1 %v2477_v18  ;;  %v2161_v50 = vld [vmem:[%s3771_s5] ss:$0 sm:$0xff]  ;;  %s1917_s24 = sshll.u32 %s1913_s19, 4  ;;  %s1918_s24 = int_to_ptr.hbm [resolvable:$true] %s1917_s24 }
  0x2d   : > { %2084 = vmatpush.msra.mxu3 %v2477_v18  ;;  %1801 = vmatpush.xpose.msra.mxu2 %v420_v39  ;;  %v2619_v0 = vld [vmem:[%s3772_s6] ss:$0 sm:$0xff]  ;;  %s2187_s26 = sshra.s32 %s1918_s24, 4  ;;  %s2188_s26 = int_to_ptr.hbm [resolvable:$true] %s2187_s26 }
  0x2e   : > { %448 = vmatpush.msra.mxu0 %v431_v13  ;;  %2085 = vmatpush.msra.mxu1 %v2488_v20  ;;  %s2189_s29 = scalar_lea.hbm %s2188_s26, 8  ;;  %p2194_p1 = scmp.lt.s32.totalorder %s2188_s26, %s3775_s9 }
  0x2f   : > { %2086 = vmatpush.msra.mxu3 %v2488_v20  ;;  %p2190_p12 = scmp.ne.s32.totalorder %s2188_s26, %s2189_s29  ;;  %p2195_p2 = scmp.lt.s32.totalorder %s2193_s14, %s2189_s29 }
  0x30   : > { %449 = vmatpush.msra.mxu0 %v430_v15  ;;  %2087 = vmatpush.msra.mxu1 %v2498_v22 }
  0x31   : > { %2088 = vmatpush.msra.mxu3 %v2498_v22  ;;  %1802 = vmatpush.xpose.msra.mxu2 %v419_v41  ;;  %p2191_p13 = pnand %p2190_p12, %p2378_p4  ;;  %p2196_p3 = por %p2195_p2, %p2194_p1 }
  0x32   : > { %450 = vmatpush.msra.mxu0 %v429_v17  ;;  %2089 = vmatpush.msra.mxu1 %v2511_v24 }
  0x33   : > { %2090 = vmatpush.msra.mxu3 %v2511_v24  ;;  %p2192_p0 = pneg %p2191_p13 }
  0x34   : > { %451 = vmatpush.msra.mxu0 %v428_v19  ;;  %2091 = vmatpush.msra.mxu1 %v2521_v26 }
  0x35   : > { %2092 = vmatpush.msra.mxu3 %v2521_v26  ;;  %1803 = vmatpush.xpose.msra.mxu2 %v418_v42  ;;  %p2197_p5 = pnand %p2196_p3, %p2192_p0 }
  0x36   : > { %452 = vmatpush.msra.mxu0 %v427_v21  ;;  %2093 = vmatpush.msra.mxu1 %v2532_v28 }
  0x37   : > { %2094 = vmatpush.msra.mxu3 %v2532_v28 }
  0x38   : > { %453 = vmatpush.msra.mxu0 %v426_v23  ;;  %2095 = vmatpush.msra.mxu1 %v464_v30 }
  0x39   : > { %2096 = vmatpush.msra.mxu3 %v464_v30  ;;  %1804 = vmatpush.xpose.msra.mxu2 %v417_v37 }
  0x3a   : > { %454 = vmatpush.msra.mxu0 %v425_v25  ;;  %2097 = vmatpush.msra.mxu1 %v463_v32 }
  0x3b   : > { %2098 = vmatpush.msra.mxu3 %v463_v32  ;;  %504 = vmatmul.f32.vlgmr.msra.gmra.mxu1 %v2561_v34 }
  0x3c   : > { %455 = vmatpush.msra.mxu0 %v424_v27  ;;  %525 = vmatmul.f32.vlgmr.msra.gmra.mxu3 %v416_v35 }
  0x3d   : > { %1860 = vmatpush.msrb.mxu3 %v421_v38  ;;  %1805 = vmatpush.xpose.msra.mxu2 %v416_v35 }
  0x3e   : > { %456 = vmatpush.msra.mxu0 %v423_v29 }
  0x3f   : > { %1861 = vmatpush.msrb.mxu3 %v420_v39 }
  0x40   : > { %457 = vmatpush.msra.mxu0 %v422_v31 }
  0x41   : > { %458 = vmatmul.f32.vlgmr.msra.gmra.mxu0 %v2558_v33  ;;  %1862 = vmatpush.msrb.mxu3 %v419_v41 }
  0x42   : > { %479 = vmatpush.msrb.mxu0 %v2399_v2  ;;  %1806 = vmatpush.xpose.msra.mxu2 %v415_v44 }
  0x43   : > { %507 = vmatmul.f32.gmra.mxu1 %v2570_v36  ;;  %1863 = vmatpush.msrb.mxu3 %v418_v42 }
  0x44   : > { %480 = vmatpush.msrb.mxu0 %v2408_v4  ;;  %528 = vmatmul.f32.gmra.mxu3 %v417_v37 }
  0x45   : > { %1864 = vmatpush.msrb.mxu3 %v417_v37 }
  0x46   : > { %481 = vmatpush.msrb.mxu0 %v2417_v6  ;;  %1807 = vmatpush.xpose.msra.mxu2 %v414_v45 }
  0x47   : > { %1865 = vmatpush.msrb.mxu3 %v416_v35 }
  0x48   : > { %482 = vmatpush.msrb.mxu0 %v2427_v8 }
  0x49   : > { %1866 = vmatpush.msrb.mxu3 %v415_v44 }
  0x4a   : > { %483 = vmatpush.msrb.mxu0 %v2437_v10  ;;  %1808 = vmatpush.xpose.msra.mxu2 %v413_v47 }
  0x4b   : > { %510 = vmatmul.f32.gmra.mxu1 %v411_v40  ;;  %1867 = vmatpush.msrb.mxu3 %v414_v45 }
  0x4c   : > { %484 = vmatpush.msrb.mxu0 %v2447_v12  ;;  %531 = vmatmul.f32.gmra.mxu3 %v418_v42 }
  0x4d   : > { %1868 = vmatpush.msrb.mxu3 %v413_v47 }
  0x4e   : > { %485 = vmatpush.msrb.mxu0 %v2457_v14  ;;  %1809 = vmatpush.xpose.msra.mxu2 %v412_v43 }
  0x4f   : > { %1869 = vmatpush.msrb.mxu3 %v412_v43 }
  0x50   : > { %486 = vmatpush.msrb.mxu0 %v2467_v16 }
  0x51   : > { %1870 = vmatpush.msrb.mxu3 %v411_v40 }
  0x52   : > { %487 = vmatpush.msrb.mxu0 %v2477_v18  ;;  %1810 = vmatpush.xpose.msra.mxu2 %v411_v40 }
  0x53   : > { %513 = vmatmul.f32.gmra.mxu1 %v412_v43  ;;  %1871 = vmatpush.msrb.mxu3 %v2570_v36 }
  0x54   : > { %488 = vmatpush.msrb.mxu0 %v2488_v20  ;;  %534 = vmatmul.f32.gmra.mxu3 %v419_v41 }
  0x55   : > { %1872 = vmatpush.msrb.mxu3 %v2561_v34 }
  0x56   : > { %489 = vmatpush.msrb.mxu0 %v2498_v22  ;;  %1811 = vmatpush.xpose.msra.mxu2 %v2570_v36 }
  0x57   : > { %1873 = vmatpush.msrb.mxu3 %v408_v49 }
  0x58   : > { %490 = vmatpush.msrb.mxu0 %v2511_v24 }
  0x59   : > { %1874 = vmatpush.msrb.mxu3 %v407_v48 }
  0x5a   : > { %491 = vmatpush.msrb.mxu0 %v2521_v26  ;;  %1812 = vmatpush.xpose.msra.mxu2 %v2561_v34 }
  0x5b   : > { %516 = vmatmul.f32.gmra.mxu1 %v413_v47  ;;  %1875 = vmatpush.msrb.mxu3 %v406_v46 }
  0x5c   : > { %492 = vmatpush.msrb.mxu0 %v2532_v28  ;;  %537 = vmatmul.f32.gmra.mxu3 %v420_v39 }
  0x5e   : > { %493 = vmatpush.msrb.mxu0 %v464_v30  ;;  %1813 = vmatpush.xpose.msra.mxu2 %v408_v49 }
  0x60   : > { %494 = vmatpush.msrb.mxu0 %v463_v32 }
  0x61   : > { %495 = vmatmul.f32.vlgmr.msrb.gmra.mxu0 %v406_v46 }
  0x62   : > { %1814 = vmatpush.xpose.msra.mxu2 %v407_v48 }
  0x63   : > { %519 = vmatmul.f32.gmra.mxu1 %v414_v45 }
  0x64   : > { %540 = vmatmul.f32.gmra.mxu3 %v421_v38 }
  0x66   : > { %1815 = vmatpush.xpose.msra.mxu2 %v406_v46 }
  0x69   : > { %498 = vmatmul.f32.gmra.mxu0 %v407_v48  ;;  %1816 = vmatmul.f32.vlgmr.msra.gmra.mxu2 %v2558_v33 }
  0x6b   : > { %522 = vmatmul.f32.gmra.mxu1 %v415_v44 }
  0x71   : > { %501 = vmatmul.f32.gmra.mxu0 %v408_v49 }
  0xb8   : > { %v505_v62 = vpop.f32.mrf.mxu1 }
  0xbe   : > { %v459_v51 = vpop.f32.mrf.mxu0 }
  0xbf   : > { %v460_v52 = vadd.f32 %v2161_v50, %v459_v51  ;;  %v2623_v3 = vpop.f32.mrf.mxu3 }
  0xc0   : > { %3794 = vst [vmem:[#allocation13_spill] sm:$0xff] %v2623_v3  ;;  %v2658_v42 = vpop.f32.mrf.mxu1 }
  0xc1   : > { %v582_v53 = vrot.slane %v460_v52, 1  ;;  %v583_v54 = vrot.slane %v460_v52, 2  ;;  %v584_v55 = vrot.slane %v460_v52, 3  ;;  %v585_v56 = vrot.slane %v460_v52, 4 }
  0xc2   : > { %v2605_v57 = vperm.slane %v460_v52, 0  ;;  %v588_v10 = vrot.slane %v460_v52, 7  ;;  %v586_v12 = vrot.slane %v460_v52, 5  ;;  %v587_v24 = vrot.slane %v460_v52, 6 }
  0xc3   : > { %v2607_v58 = vperm.slane %v582_v53, 0  ;;  %v2609_v59 = vperm.slane %v583_v54, 0  ;;  %v2611_v60 = vperm.slane %v584_v55, 0  ;;  %v2613_v61 = vperm.slane %v585_v56, 0 }
  0xc4   : > { %v608_v63 = vadd.f32 %v2605_v57, %v505_v62  ;;  %v615_v8 = vadd.f32 %v2605_v57, %v2623_v3  ;;  %v2632_v18 = vperm.slane %v588_v10, 0  ;;  %v2634_v19 = vperm.slane %v586_v12, 0 }
  0xc5   : > { %3793 = vst [vmem:[#allocation12_spill] sm:$0xff] %v2611_v60  ;;  %v640_v1 = vadd.f32 %v2609_v59, %v505_v62  ;;  %v624_v2 = vadd.f32 %v2607_v58, %v505_v62  ;;  %v656_v5 = vadd.f32 %v2611_v60, %v505_v62  ;;  %v672_v9 = vadd.f32 %v2613_v61, %v505_v62 }
  0xc6   : > { %v736_v4 = vmax.f32 %v608_v63, 0.0  ;;  %v743_v15 = vmax.f32 %v615_v8, 0.0  ;;  %3795 = vst [vmem:[#allocation14_spill] sm:$0xff] %v2632_v18  ;;  %v720_v23 = vadd.f32 %v2632_v18, %v505_v62  ;;  %v688_v25 = vadd.f32 %v2634_v19, %v505_v62 }
  0xc7   : > { %v768_v6 = vmax.f32 %v640_v1, 0.0  ;;  %v752_v7 = vmax.f32 %v624_v2, 0.0  ;;  %v784_v16 = vmax.f32 %v656_v5, 0.0  ;;  %v800_v17 = vmax.f32 %v672_v9, 0.0  ;;  %v2663_v48 = vpop.f32.mrf.mxu3 }
  0xc8   : > { %v867_v11 = vmul.f32 %v2619_v0, %v736_v4  ;;  %v874_v20 = vmul.f32 %v2619_v0, %v743_v15  ;;  %v848_v26 = vmax.f32 %v720_v23, 0.0  ;;  %v2641_v27 = vperm.slane %v587_v24, 0  ;;  %v2694_v23 = vpop.f32.mrf.mxu1 }
  0xc9   : > { %v899_v13 = vmul.f32 %v2619_v0, %v768_v6  ;;  %v883_v14 = vmul.f32 %v2619_v0, %v752_v7  ;;  %v915_v21 = vmul.f32 %v2619_v0, %v784_v16  ;;  %v931_v22 = vmul.f32 %v2619_v0, %v800_v17  ;;  %v561_v6 = vld [vmem:[#allocation5] sm:$0x1] }
  0xca   : > { %998 = vadd.xlane.f32.xlu1 %v867_v11  ;;  %v816_v28 = vmax.f32 %v688_v25, 0.0  ;;  %v979_v29 = vmul.f32 %v2619_v0, %v848_v26  ;;  %v647_v30 = vadd.f32 %v2609_v59, %v2623_v3  ;;  %v704_v32 = vadd.f32 %v2641_v27, %v505_v62  ;;  %2099 = vpush %v561_v6 }
  0xcb   : > { %1062 = vadd.xlane.f32.xlu2 %v899_v13  ;;  %1030 = vadd.xlane.f32.xlu0 %v883_v14  ;;  %v631_v41 = vadd.f32 %v2607_v58, %v2623_v3  ;;  %v705_v44 = vadd.f32 %v2641_v27, %v2658_v42  ;;  %v609_v52 = vadd.f32 %v2605_v57, %v2658_v42 }
  0xcc   : > { %v947_v31 = vmul.f32 %v2619_v0, %v816_v28  ;;  %v775_v33 = vmax.f32 %v647_v30, 0.0  ;;  %v832_v34 = vmax.f32 %v704_v32, 0.0  ;;  %v632_v54 = vadd.f32 %v2607_v58, %v2663_v48 }
  0xcd   : > { %v759_v46 = vmax.f32 %v631_v41, 0.0  ;;  %v833_v47 = vmax.f32 %v705_v44, 0.0  ;;  %v737_v56 = vmax.f32 %v609_v52, 0.0  ;;  %v625_v2 = vadd.f32 %v2607_v58, %v2658_v42 }
  0xce   : > { %v906_v37 = vmul.f32 %v2619_v0, %v775_v33  ;;  %v963_v39 = vmul.f32 %v2619_v0, %v832_v34  ;;  %v760_v62 = vmax.f32 %v632_v54, 0.0  ;;  %v657_v15 = vadd.f32 %v2611_v60, %v2658_v42 }
  0xcf   : > { %v890_v51 = vmul.f32 %v2619_v0, %v759_v46  ;;  %v964_v53 = vmul.f32 %v2619_v0, %v833_v47  ;;  %v868_v4 = vmul.f32 %v2619_v0, %v737_v56  ;;  %v753_v9 = vmax.f32 %v625_v2, 0.0 }
  0xd0   : > { %v891_v7 = vmul.f32 %v2619_v0, %v760_v62  ;;  %v641_v25 = vadd.f32 %v2609_v59, %v2658_v42  ;;  %v626_v30 = vadd.f32 %v2607_v58, %v2694_v23  ;;  %v673_v46 = vadd.f32 %v2613_v61, %v2658_v42 }
  0xd1   : > { %v884_v12 = vmul.f32 %v2619_v0, %v753_v9 }
  0xd2   : > { %1012 = vadd.xlane.f32.xlu1 %v874_v20  ;;  %v754_v33 = vmax.f32 %v626_v30, 0.0  ;;  %v801_v52 = vmax.f32 %v673_v46, 0.0 }
  0xd3   : > { %1094 = vadd.xlane.f32.xlu2 %v915_v21  ;;  %1126 = vadd.xlane.f32.xlu0 %v931_v22  ;;  %v785_v21 = vmax.f32 %v657_v15, 0.0 }
  0xd5   : > { %v916_v26 = vmul.f32 %v2619_v0, %v785_v21 }
  0xda   : > { %1222 = vadd.xlane.f32.xlu1 %v979_v29 }
  0xdb   : > { %1158 = vadd.xlane.f32.xlu2 %v947_v31  ;;  %v769_v31 = vmax.f32 %v641_v25, 0.0 }
  0xdd   : > { %v900_v34 = vmul.f32 %v2619_v0, %v769_v31  ;;  %v706_v31 = vadd.f32 %v2641_v27, %v2694_v23 }
  0xde   : > { %v2648_v35 = vpop.f32.mrf.mxu0 }
  0xdf   : > { %v605_v36 = vadd.f32 %v2605_v57, %v2648_v35  ;;  %v621_v38 = vadd.f32 %v2607_v58, %v2648_v35  ;;  %v637_v50 = vadd.f32 %v2609_v59, %v2648_v35  ;;  %v653_v5 = vadd.f32 %v2611_v60, %v2648_v35 }
  0xe0   : > { %v669_v13 = vadd.f32 %v2613_v61, %v2648_v35  ;;  %v701_v28 = vadd.f32 %v2641_v27, %v2648_v35  ;;  %v717_v56 = vadd.f32 %v2632_v18, %v2648_v35 }
  0xe1   : > { %v733_v40 = vmax.f32 %v605_v36, 0.0  ;;  %v749_v45 = vmax.f32 %v621_v38, 0.0  ;;  %v765_v55 = vmax.f32 %v637_v50, 0.0  ;;  %v781_v10 = vmax.f32 %v653_v5, 0.0 }
  0xe2   : > { %1076 = vadd.xlane.f32.xlu1 %v906_v37  ;;  %v797_v20 = vmax.f32 %v669_v13, 0.0  ;;  %v829_v32 = vmax.f32 %v701_v28, 0.0  ;;  %v685_v36 = vadd.f32 %v2634_v19, %v2648_v35  ;;  %v721_v38 = vadd.f32 %v2632_v18, %v2658_v42 }
  0xe3   : > { %1190 = vadd.xlane.f32.xlu2 %v963_v39  ;;  %v864_v43 = vmul.f32 %v2619_v0, %v733_v40  ;;  %v880_v49 = vmul.f32 %v2619_v0, %v749_v45  ;;  %v896_v1 = vmul.f32 %v2619_v0, %v765_v55  ;;  %v912_v14 = vmul.f32 %v2619_v0, %v781_v10 }
  0xe4   : > { %v928_v24 = vmul.f32 %v2619_v0, %v797_v20  ;;  %v960_v37 = vmul.f32 %v2619_v0, %v829_v32  ;;  %v885_v39 = vmul.f32 %v2619_v0, %v754_v33  ;;  %v813_v41 = vmax.f32 %v685_v36, 0.0 }
  0xe5   : > { %992 = vadd.xlane.f32.xlu0 %v864_v43  ;;  %v849_v43 = vmax.f32 %v721_v38, 0.0  ;;  %v932_v55 = vmul.f32 %v2619_v0, %v801_v52  ;;  %v845_v5 = vmax.f32 %v717_v56, 0.0  ;;  %v689_v35 = vadd.f32 %v2634_v19, %v2658_v42 }
  0xe6   : > { %v2674_v63 = vpop.f32.mrf.mxu0  ;;  %v944_v45 = vmul.f32 %v2619_v0, %v813_v41  ;;  %v610_v10 = vadd.f32 %v2605_v57, %v2694_v23 }
  0xe7   : > { %v606_v8 = vadd.f32 %v2605_v57, %v2674_v63  ;;  %v654_v17 = vadd.f32 %v2611_v60, %v2674_v63  ;;  %v702_v40 = vadd.f32 %v2641_v27, %v2674_v63  ;;  %v980_v47 = vmul.f32 %v2619_v0, %v849_v43 }
  0xe8   : > { %v817_v13 = vmax.f32 %v689_v35, 0.0  ;;  %v622_v21 = vadd.f32 %v2607_v58, %v2674_v63  ;;  %v638_v33 = vadd.f32 %v2609_v59, %v2674_v63 }
  0xe9   : > { %v734_v11 = vmax.f32 %v606_v8, 0.0  ;;  %v782_v22 = vmax.f32 %v654_v17, 0.0  ;;  %v830_v44 = vmax.f32 %v702_v40, 0.0  ;;  %v976_v8 = vmul.f32 %v2619_v0, %v845_v5 }
  0xea   : > { %1024 = vadd.xlane.f32.xlu1 %v880_v49  ;;  %v616_v49 = vadd.f32 %v2605_v57, %v2663_v48  ;;  %v948_v42 = vmul.f32 %v2619_v0, %v817_v13  ;;  %v642_v17 = vadd.f32 %v2609_v59, %v2694_v23  ;;  %v766_v38 = vmax.f32 %v638_v33, 0.0 }
  0xeb   : > { %1044 = vadd.xlane.f32.xlu2 %v890_v51  ;;  %v865_v16 = vmul.f32 %v2619_v0, %v734_v11  ;;  %v913_v29 = vmul.f32 %v2619_v0, %v782_v22  ;;  %v961_v50 = vmul.f32 %v2619_v0, %v830_v44  ;;  %v658_v51 = vadd.f32 %v2611_v60, %v2694_v23 }
  0xec   : > { %v770_v25 = vmax.f32 %v642_v17, 0.0  ;;  %v897_v44 = vmul.f32 %v2619_v0, %v766_v38 }
  0xed   : > { %1192 = vadd.xlane.f32.xlu0 %v964_v53  ;;  %v744_v53 = vmax.f32 %v616_v49, 0.0  ;;  %v786_v54 = vmax.f32 %v658_v51, 0.0 }
  0xee   : > { %v901_v30 = vmul.f32 %v2619_v0, %v770_v25  ;;  %v2763_v40 = vpop.f32.mrf.mxu0 }
  0xef   : > { %v875_v62 = vmul.f32 %v2619_v0, %v744_v53  ;;  %v917_v2 = vmul.f32 %v2619_v0, %v786_v54 }
  0xf2   : > { %1056 = vadd.xlane.f32.xlu1 %v896_v1  ;;  %v648_v1 = vadd.f32 %v2609_v59, %v2663_v48 }
  0xf3   : > { %1000 = vadd.xlane.f32.xlu2 %v868_v4  ;;  %v674_v4 = vadd.f32 %v2613_v61, %v2694_v23 }
  0xf4   : > { %v776_v6 = vmax.f32 %v648_v1, 0.0 }
  0xf5   : > { %1046 = vadd.xlane.f32.xlu0 %v891_v7  ;;  %v802_v7 = vmax.f32 %v674_v4, 0.0 }
  0xf6   : > { %v907_v9 = vmul.f32 %v2619_v0, %v776_v6 }
  0xf7   : > { %v933_v11 = vmul.f32 %v2619_v0, %v802_v7 }
  0xfa   : > { %1032 = vadd.xlane.f32.xlu1 %v884_v12  ;;  %v722_v12 = vadd.f32 %v2632_v18, %v2694_v23 }
  0xfb   : > { %1088 = vadd.xlane.f32.xlu2 %v912_v14  ;;  %v738_v14 = vmax.f32 %v610_v10, 0.0  ;;  %v639_v10 = vadd.f32 %v2609_v59, %v2763_v40  ;;  %s2100_s10 = spop %2099 }
  0xfc   : > { %v850_v15 = vmax.f32 %v722_v12, 0.0  ;;  %v718_v12 = vadd.f32 %v2632_v18, %v2674_v63 }
  0xfd   : > { %994 = vadd.xlane.f32.xlu0 %v865_v16  ;;  %v2741_v16 = vpop.f32.mrf.mxu3  ;;  %v869_v20 = vmul.f32 %v2619_v0, %v738_v14  ;;  %v671_v14 = vadd.f32 %v2613_v61, %v2763_v40 }
  0xfe   : > { %v981_v22 = vmul.f32 %v2619_v0, %v850_v15  ;;  %v633_v43 = vadd.f32 %v2607_v58, %v2741_v16  ;;  %v767_v15 = vmax.f32 %v639_v10, 0.0  ;;  %v846_v17 = vmax.f32 %v718_v12, 0.0 }
 0x100   : > { %v761_v49 = vmax.f32 %v633_v43, 0.0  ;;  %v977_v25 = vmul.f32 %v2619_v0, %v846_v17  ;;  %v1504_v17 = vlaneseq }
 0x102   : > { %1120 = vadd.xlane.f32.xlu1 %v928_v24  ;;  %v617_v24 = vadd.f32 %v2605_v57, %v2741_v16  ;;  %v892_v54 = vmul.f32 %v2619_v0, %v761_v49 }
 0x103   : > { %1096 = vadd.xlane.f32.xlu2 %v916_v26  ;;  %v750_v26 = vmax.f32 %v622_v21, 0.0  ;;  %v799_v21 = vmax.f32 %v671_v14, 0.0 }
 0x104   : > { %v745_v28 = vmax.f32 %v617_v24, 0.0  ;;  %v898_v24 = vmul.f32 %v2619_v0, %v767_v15 }
 0x105   : > { %1090 = vadd.xlane.f32.xlu0 %v913_v29  ;;  %v2752_v29 = vpop.f32.mrf.mxu1  ;;  %v881_v32 = vmul.f32 %v2619_v0, %v750_v26  ;;  %v690_v26 = vadd.f32 %v2634_v19, %v2694_v23 }
 0x106   : > { %v611_v36 = vadd.f32 %v2605_v57, %v2752_v29  ;;  %v675_v23 = vadd.f32 %v2613_v61, %v2752_v29 }
 0x107   : > { %v818_v33 = vmax.f32 %v690_v26, 0.0  ;;  %v2864_v26 = vand.u32 127, %v1504_v17 }
 0x10a   : > { %1064 = vadd.xlane.f32.xlu1 %v900_v34  ;;  %v876_v34 = vmul.f32 %v2619_v0, %v745_v28  ;;  %v930_v28 = vmul.f32 %v2619_v0, %v799_v21  ;;  %v707_v21 = vadd.f32 %v2641_v27, %v2752_v29 }
 0x10b   : > { %1184 = vadd.xlane.f32.xlu2 %v960_v37  ;;  %v834_v37 = vmax.f32 %v706_v31, 0.0 }
 0x10d   : > { %1034 = vadd.xlane.f32.xlu0 %v885_v39  ;;  %v739_v39 = vmax.f32 %v611_v36, 0.0  ;;  %v965_v41 = vmul.f32 %v2619_v0, %v834_v37 }
 0x10f   : > { %v870_v46 = vmul.f32 %v2619_v0, %v739_v39  ;;  %v949_v39 = vmul.f32 %v2619_v0, %v818_v33 }
 0x112   : > { %1152 = vadd.xlane.f32.xlu1 %v944_v45  ;;  %v670_v45 = vadd.f32 %v2613_v61, %v2674_v63 }
 0x113   : > { %1224 = vadd.xlane.f32.xlu2 %v980_v47  ;;  %v623_v47 = vadd.f32 %v2607_v58, %v2763_v40 }
 0x114   : > { %v798_v51 = vmax.f32 %v670_v45, 0.0  ;;  %v803_v45 = vmax.f32 %v675_v23, 0.0 }
 0x115   : > { %1186 = vadd.xlane.f32.xlu0 %v961_v50  ;;  %v751_v53 = vmax.f32 %v623_v47, 0.0 }
 0x116   : > { %v929_v56 = vmul.f32 %v2619_v0, %v798_v51 }
 0x117   : > { %v882_v1 = vmul.f32 %v2619_v0, %v751_v53 }
 0x11a   : > { %1128 = vadd.xlane.f32.xlu1 %v932_v55  ;;  %v607_v55 = vadd.f32 %v2605_v57, %v2763_v40 }
 0x11b   : > { %1014 = vadd.xlane.f32.xlu2 %v875_v62  ;;  %v686_v62 = vadd.f32 %v2634_v19, %v2674_v63  ;;  %v687_v63 = vadd.f32 %v2634_v19, %v2763_v40 }
 0x11c   : > { %v735_v4 = vmax.f32 %v607_v55, 0.0  ;;  %v934_v55 = vmul.f32 %v2619_v0, %v803_v45 }
 0x11d   : > { %1098 = vadd.xlane.f32.xlu0 %v917_v2  ;;  %v655_v2 = vadd.f32 %v2611_v60, %v2763_v40  ;;  %v814_v6 = vmax.f32 %v686_v62, 0.0  ;;  %v815_v31 = vmax.f32 %v687_v63, 0.0  ;;  %v691_v63 = vadd.f32 %v2634_v19, %v2752_v29 }
 0x11f   : > { %v783_v35 = vmax.f32 %v655_v2, 0.0  ;;  %v946_v38 = vmul.f32 %v2619_v0, %v815_v31  ;;  %v2868_v31 = vstv %s2100_s10  ;;  %v819_v23 = vmax.f32 %v691_v63, 0.0 }
 0x121   : > { %v914_v13 = vmul.f32 %v2619_v0, %v783_v35  ;;  %v2847_v35 = vpop.f32.mrf.mxu1 }
 0x122   : > { %1216 = vadd.xlane.f32.xlu1 %v976_v8  ;;  %v612_v15 = vadd.f32 %v2605_v57, %v2847_v35 }
 0x123   : > { %1078 = vadd.xlane.f32.xlu2 %v907_v9  ;;  %v866_v9 = vmul.f32 %v2619_v0, %v735_v4  ;;  %v719_v4 = vadd.f32 %v2632_v18, %v2763_v40 }
 0x125   : > { %1130 = vadd.xlane.f32.xlu0 %v933_v11  ;;  %v945_v11 = vmul.f32 %v2619_v0, %v814_v6  ;;  %v847_v12 = vmax.f32 %v719_v4, 0.0 }
 0x12a   : > { %1160 = vadd.xlane.f32.xlu1 %v948_v42 }
 0x12b   : > { %1002 = vadd.xlane.f32.xlu2 %v869_v20 }
 0x12d   : > { %1226 = vadd.xlane.f32.xlu0 %v981_v22 }
 0x132   : > { %1066 = vadd.xlane.f32.xlu1 %v901_v30  ;;  %v627_v30 = vadd.f32 %v2607_v58, %v2752_v29 }
 0x133   : > { %1026 = vadd.xlane.f32.xlu2 %v881_v32 }
 0x134   : > { %v755_v36 = vmax.f32 %v627_v30, 0.0  ;;  %v835_v30 = vmax.f32 %v707_v21, 0.0  ;;  %v644_v21 = vadd.f32 %v2609_v59, %v2847_v35 }
 0x135   : > { %1016 = vadd.xlane.f32.xlu0 %v876_v34 }
 0x136   : > { %v886_v43 = vmul.f32 %v2619_v0, %v755_v36  ;;  %v966_v45 = vmul.f32 %v2619_v0, %v835_v30 }
 0x13a   : > { %1194 = vadd.xlane.f32.xlu1 %v965_v41  ;;  %v643_v41 = vadd.f32 %v2609_v59, %v2752_v29 }
 0x13b   : > { %1058 = vadd.xlane.f32.xlu2 %v897_v44  ;;  %v703_v44 = vadd.f32 %v2641_v27, %v2763_v40 }
 0x13c   : > { %v771_v49 = vmax.f32 %v643_v41, 0.0 }
 0x13d   : > { %v2774_v50 = vpop.xlane.xlu1 %998  ;;  %1004 = vadd.xlane.f32.xlu0 %v870_v46  ;;  %v2830_v46 = vpop.f32.mrf.mxu3  ;;  %v831_v53 = vmax.f32 %v703_v44, 0.0 }
 0x13e   : > { %v2776_v52 = vpop.xlane.xlu2 %1062  ;;  %v2789_v7 = vpop.xlane.xlu0 %1030  ;;  %3800 = vst [vmem:[#allocation19_spill] sm:$0xff] %v2830_v46  ;;  %v902_v62 = vmul.f32 %v2619_v0, %v771_v49  ;;  %v676_v49 = vadd.f32 %v2613_v61, %v2847_v35 }
 0x13f   : > { %v962_v2 = vmul.f32 %v2619_v0, %v831_v53 }
 0x140   : > { %v804_v4 = vmax.f32 %v676_v49, 0.0 }
 0x142   : > { %1048 = vadd.xlane.f32.xlu1 %v892_v54  ;;  %v935_v63 = vmul.f32 %v2619_v0, %v804_v4 }
 0x143   : > { %1122 = vadd.xlane.f32.xlu2 %v929_v56  ;;  %v618_v56 = vadd.f32 %v2605_v57, %v2830_v46 }
 0x145   : > { %v2787_v5 = vpop.xlane.xlu1 %1012  ;;  %1028 = vadd.xlane.f32.xlu0 %v882_v1  ;;  %v659_v1 = vadd.f32 %v2611_v60, %v2752_v29  ;;  %v746_v6 = vmax.f32 %v618_v56, 0.0  ;;  %v660_v56 = vadd.f32 %v2611_v60, %v2847_v35 }
 0x146   : > { %3796 = vst [vmem:[#allocation15_spill] sm:$0xff] %v2787_v5  ;;  %v2791_v8 = vpop.xlane.xlu2 %1094  ;;  %v2806_v22 = vpop.xlane.xlu0 %1126 }
 0x147   : > { %v787_v10 = vmax.f32 %v659_v1, 0.0  ;;  %v877_v14 = vmul.f32 %v2619_v0, %v746_v6  ;;  %v2891_v6 = vpop.f32.mrf.mxu3 }
 0x149   : > { %v918_v40 = vmul.f32 %v2619_v0, %v787_v10 }
 0x14a   : > { %996 = vadd.xlane.f32.xlu1 %v866_v9 }
 0x14b   : > { %1154 = vadd.xlane.f32.xlu2 %v945_v11 }
 0x14d   : > { %v2802_v42 = vpop.xlane.xlu1 %1222  ;;  %1092 = vadd.xlane.f32.xlu0 %v914_v13 }
 0x14e   : > { %3797 = vst [vmem:[#allocation16_spill] sm:$0xff] %v2802_v42  ;;  %v2804_v20 = vpop.xlane.xlu2 %1158 }
 0x152   : > { %1060 = vadd.xlane.f32.xlu1 %v898_v24  ;;  %v978_v24 = vmul.f32 %v2619_v0, %v847_v12 }
 0x153   : > { %1218 = vadd.xlane.f32.xlu2 %v977_v25  ;;  %v740_v25 = vmax.f32 %v612_v15, 0.0  ;;  %v2896_v15 = vpop.f32.mrf.mxu1 }
 0x155   : > { %v2817_v32 = vpop.xlane.xlu1 %1076  ;;  %1124 = vadd.xlane.f32.xlu0 %v930_v28  ;;  %v871_v41 = vmul.f32 %v2619_v0, %v740_v25  ;;  %v619_v25 = vadd.f32 %v2605_v57, %v2891_v6 }
 0x156   : > { %3798 = vst [vmem:[#allocation17_spill] sm:$0xff] %v2817_v32  ;;  %v2819_v34 = vpop.xlane.xlu2 %1190 }
 0x157   : > { %3799 = vst [vmem:[#allocation18_spill] sm:$0xff] %v2819_v34 }
 0x158   : > { %v993_v37 = vpop.xlane.xlu0 %992 }
 0x159   : > { %v1248_v36 = vadd.f32 %v993_v37, %v2868_v31 }
 0x15a   : > { %1156 = vadd.xlane.f32.xlu1 %v946_v38  ;;  %v2872_v38 = vadd.s32 4294967288, %v2864_v26 }
 0x15b   : > { %1162 = vadd.xlane.f32.xlu2 %v949_v39  ;;  %v1506_v37 = vperm.slane %v1248_v36, %v2864_v26 }
 0x15d   : > { %1036 = vadd.xlane.f32.xlu0 %v886_v43  ;;  %v2832_v47 = vpop.xlane.xlu1 %1024  ;;  %v628_v43 = vadd.f32 %v2607_v58, %v2847_v35 }
 0x15e   : > { %v2834_v51 = vpop.xlane.xlu2 %1044 }
 0x15f   : > { %3801 = vst [vmem:[#allocation20_spill] sm:$0xff] %v2834_v51 }
 0x160   : > { %v2836_v54 = vpop.xlane.xlu0 %1192 }
 0x161   : > { %3802 = vst [vmem:[#allocation21_spill] sm:$0xff] %v2836_v54 }
 0x162   : > { %1132 = vadd.xlane.f32.xlu1 %v934_v55  ;;  %v950_v55 = vmul.f32 %v2619_v0, %v819_v23  ;;  %v629_v23 = vadd.f32 %v2607_v58, %v2896_v15 }
 0x163   : > { %1068 = vadd.xlane.f32.xlu2 %v902_v62  ;;  %v756_v62 = vmax.f32 %v628_v43, 0.0 }
 0x164   : > { %v757_v49 = vmax.f32 %v629_v23, 0.0 }
 0x165   : > { %1188 = vadd.xlane.f32.xlu0 %v962_v2  ;;  %v2849_v9 = vpop.xlane.xlu1 %1056 }
 0x166   : > { %v2851_v11 = vpop.xlane.xlu2 %1000  ;;  %v888_v4 = vmul.f32 %v2619_v0, %v757_v49 }
 0x168   : > { %v2853_v13 = vpop.xlane.xlu0 %1046 }
 0x169   : > { %3803 = vst [vmem:[#allocation22_spill] sm:$0xff] %v2853_v13 }
 0x16a   : > { %1018 = vadd.xlane.f32.xlu1 %v877_v14  ;;  %v788_v14 = vmax.f32 %v660_v56, 0.0 }
 0x16b   : > { %1100 = vadd.xlane.f32.xlu2 %v918_v40  ;;  %v887_v40 = vmul.f32 %v2619_v0, %v756_v62  ;;  %v613_v62 = vadd.f32 %v2605_v57, %v2896_v15 }
 0x16c   : > { %v919_v36 = vmul.f32 %v2619_v0, %v788_v14 }
 0x16d   : > { %1220 = vadd.xlane.f32.xlu0 %v978_v24  ;;  %v2866_v28 = vpop.xlane.xlu1 %1032 }
 0x16e   : > { %v1089_v33 = vpop.xlane.xlu2 %1088 }
 0x16f   : > { %v1296_v12 = vadd.f32 %v1089_v33, %v2868_v31 }
 0x170   : > { %v995_v39 = vpop.xlane.xlu0 %994 }
 0x171   : > { %v1249_v44 = vadd.f32 %v995_v39, %v2868_v31  ;;  %v1629_v30 = vperm.slane %v1296_v12, %v2864_v26  ;;  %v772_v39 = vmax.f32 %v644_v21, 0.0  ;;  %v677_v12 = vadd.f32 %v2613_v61, %v2896_v15 }
 0x172   : > { %1006 = vadd.xlane.f32.xlu1 %v871_v41 }
 0x173   : > { %v1508_v53 = vperm.slane %v1249_v44, %v2872_v38  ;;  %1196 = vadd.xlane.f32.xlu2 %v966_v45  ;;  %v747_v44 = vmax.f32 %v619_v25, 0.0  ;;  %v2931_v25 = vpop.f32.mrf.mxu3 }
 0x175   : > { %v2887_v1 = vsel %vm1509_vm0, %v1508_v53, %v1506_v37  ;;  %1164 = vadd.xlane.f32.xlu0 %v950_v55  ;;  %v2889_v2 = vpop.xlane.xlu1 %1120  ;;  %v903_v53 = vmul.f32 %v2619_v0, %v772_v39  ;;  %v692_v55 = vadd.f32 %v2634_v19, %v2847_v35  ;;  %v878_v56 = vmul.f32 %v2619_v0, %v747_v44 }
 0x176   : > { %v2893_v10 = vpop.xlane.xlu2 %1096  ;;  %v645_v44 = vadd.f32 %v2609_v59, %v2896_v15 }
 0x177   : > { %v820_v14 = vmax.f32 %v692_v55, 0.0  ;;  %v620_v55 = vadd.f32 %v2605_v57, %v2931_v25 }
 0x178   : > { %v1091_v17 = vpop.xlane.xlu0 %1090 }
 0x179   : > { %v1297_v24 = vadd.f32 %v1091_v17, %v2868_v31 }
 0x17a   : > { %1038 = vadd.xlane.f32.xlu1 %v887_v40  ;;  %v741_v40 = vmax.f32 %v613_v62, 0.0  ;;  %v2945_v62 = vpop.f32.mrf.mxu1 }
 0x17b   : > { %v1630_v33 = vperm.slane %v1297_v24, %v2872_v38  ;;  %1134 = vadd.xlane.f32.xlu2 %v935_v63  ;;  %v805_v63 = vmax.f32 %v677_v12, 0.0 }
 0x17c   : > { %v872_v39 = vmul.f32 %v2619_v0, %v741_v40 }
 0x17d   : > { %v2911_v41 = vsel %vm1509_vm0, %v1630_v33, %v1629_v30  ;;  %1102 = vadd.xlane.f32.xlu0 %v919_v36  ;;  %v2913_v43 = vpop.xlane.xlu1 %1064  ;;  %v951_v33 = vmul.f32 %v2619_v0, %v820_v14  ;;  %v661_v36 = vadd.f32 %v2611_v60, %v2896_v15  ;;  %v773_v14 = vmax.f32 %v645_v44, 0.0 }
 0x17e   : > { %v1185_v45 = vpop.xlane.xlu2 %1184  ;;  %v614_v44 = vadd.f32 %v2605_v57, %v2945_v62  ;;  %v693_v57 = vadd.f32 %v2634_v19, %v2896_v15 }
 0x17f   : > { %v1344_v24 = vadd.f32 %v1185_v45, %v2868_v31 }
 0x180   : > { %v2915_v37 = vpop.xlane.xlu0 %1034 }
 0x181   : > { %v1722_v49 = vperm.slane %v1344_v24, %v2864_v26  ;;  %v748_v24 = vmax.f32 %v620_v55, 0.0 }
 0x182   : > { %1070 = vadd.xlane.f32.xlu1 %v903_v53  ;;  %v936_v53 = vmul.f32 %v2619_v0, %v805_v63 }
 0x183   : > { %1020 = vadd.xlane.f32.xlu2 %v878_v56  ;;  %v789_v56 = vmax.f32 %v661_v36, 0.0  ;;  %v904_v36 = vmul.f32 %v2619_v0, %v773_v14 }
 0x185   : > { %1040 = vadd.xlane.f32.xlu0 %v888_v4  ;;  %v2926_v17 = vpop.xlane.xlu1 %1152  ;;  %v920_v63 = vmul.f32 %v2619_v0, %v789_v56  ;;  %v742_v56 = vmax.f32 %v614_v44, 0.0  ;;  %v821_v44 = vmax.f32 %v693_v57, 0.0  ;;  %v663_v57 = vadd.f32 %v2611_v60, %v2623_v3 }
 0x186   : > { %v2928_v21 = vpop.xlane.xlu2 %1224 }
 0x187   : > { %3804 = vst [vmem:[#allocation23_spill] sm:$0xff] %v2928_v21  ;;  %v791_v13 = vmax.f32 %v663_v57, 0.0  ;;  %v708_v57 = vadd.f32 %v2641_v27, %v2847_v35 }
 0x188   : > { %v1187_v30 = vpop.xlane.xlu0 %1186 }
 0x189   : > { %v1345_v23 = vadd.f32 %v1187_v30, %v2868_v31 }
 0x18a   : > { %1166 = vadd.xlane.f32.xlu1 %v951_v33  ;;  %v630_v33 = vadd.f32 %v2607_v58, %v2945_v62 }
 0x18b   : > { %v1723_v45 = vperm.slane %v1345_v23, %v2872_v38  ;;  %1008 = vadd.xlane.f32.xlu2 %v872_v39  ;;  %v662_v23 = vadd.f32 %v2611_v60, %v2945_v62  ;;  %v879_v39 = vmul.f32 %v2619_v0, %v748_v24 }
 0x18d   : > { %v2948_v4 = vsel %vm1509_vm0, %v1723_v45, %v1722_v49  ;;  %1136 = vadd.xlane.f32.xlu0 %v936_v53  ;;  %v2950_v12 = vpop.xlane.xlu1 %1128  ;;  %v758_v49 = vmax.f32 %v630_v33, 0.0  ;;  %v790_v53 = vmax.f32 %v662_v23, 0.0  ;;  %v873_v33 = vmul.f32 %v2619_v0, %v742_v56 }
 0x18e   : > { %3805 = vst [vmem:[#allocation24_spill] sm:$0xff] %v2948_v4  ;;  %v2952_v40 = vpop.xlane.xlu2 %1014  ;;  %v952_v56 = vmul.f32 %v2619_v0, %v821_v44 }
 0x18f   : > { %3806 = vst [vmem:[#allocation25_spill] sm:$0xff] %v2952_v40  ;;  %v889_v14 = vmul.f32 %v2619_v0, %v758_v49  ;;  %v921_v24 = vmul.f32 %v2619_v0, %v790_v53 }
 0x190   : > { %v2954_v30 = vpop.xlane.xlu0 %1098 }
 0x192   : > { %1104 = vadd.xlane.f32.xlu1 %v920_v63  ;;  %v678_v63 = vadd.f32 %v2613_v61, %v2945_v62 }
 0x193   : > { %1072 = vadd.xlane.f32.xlu2 %v904_v36  ;;  %v646_v36 = vadd.f32 %v2609_v59, %v2945_v62 }
 0x194   : > { %v806_v23 = vmax.f32 %v678_v63, 0.0 }
 0x195   : > { %1022 = vadd.xlane.f32.xlu0 %v879_v39  ;;  %v2965_v45 = vpop.xlane.xlu1 %1216 }
 0x196   : > { %v2967_v55 = vpop.xlane.xlu2 %1078  ;;  %v937_v53 = vmul.f32 %v2619_v0, %v806_v23 }
 0x197   : > { %3807 = vst [vmem:[#allocation26_spill] sm:$0xff] %v2967_v55  ;;  %v774_v55 = vmax.f32 %v646_v36, 0.0  ;;  %v1264_v36 = vadd.f32 %v2832_v47, %v2868_v31 }
 0x198   : > { %v2969_v32 = vpop.xlane.xlu0 %1130 }
 0x199   : > { %v905_v63 = vmul.f32 %v2619_v0, %v774_v55  ;;  %v664_v55 = vadd.f32 %v2611_v60, %v2663_v48  ;;  %v1567_v47 = vperm.slane %v1264_v36, %v2864_v26  ;;  %v1280_v36 = vadd.f32 %v2849_v9, %v2868_v31 }
 0x19a   : > { %1042 = vadd.xlane.f32.xlu1 %v889_v14  ;;  %v723_v14 = vadd.f32 %v2632_v18, %v2752_v29  ;;  %v695_v9 = vadd.f32 %v2634_v19, %v2623_v3 }
 0x19b   : > { %1106 = vadd.xlane.f32.xlu2 %v921_v24  ;;  %v634_v24 = vadd.f32 %v2607_v58, %v2830_v46 }
 0x19c   : > { %v823_v34 = vmax.f32 %v695_v9, 0.0  ;;  %v1251_v9 = vadd.f32 %v2774_v50, %v2868_v31  ;;  %v1269_v50 = vadd.f32 %v2915_v37, %v2868_v31  ;;  %v1328_v37 = vadd.f32 %v2926_v17, %v2868_v31 }
 0x19d   : > { %1010 = vadd.xlane.f32.xlu0 %v873_v33  ;;  %v2980_v39 = vpop.xlane.xlu1 %1160  ;;  %v851_v33 = vmax.f32 %v723_v14, 0.0  ;;  %v762_v29 = vmax.f32 %v634_v24, 0.0  ;;  %v679_v14 = vadd.f32 %v2613_v61, %v2623_v3 }
 0x19e   : > { %v2982_v49 = vpop.xlane.xlu2 %1002 }
 0x19f   : > { %v893_v24 = vmul.f32 %v2619_v0, %v762_v29 }
 0x1a0   : > { %v2984_v40 = vpop.xlane.xlu0 %1226 }
 0x1a1   : > { %3808 = vst [vmem:[#allocation27_spill] sm:$0xff] %v2984_v40  ;;  %v709_v40 = vadd.f32 %v2641_v27, %v2896_v15 }
 0x1a2   : > { %1138 = vadd.xlane.f32.xlu1 %v937_v53  ;;  %v982_v53 = vmul.f32 %v2619_v0, %v851_v33  ;;  %v792_v33 = vmax.f32 %v664_v55, 0.0  ;;  %v650_v55 = vadd.f32 %v2609_v59, %v2830_v46 }
 0x1a3   : > { %1168 = vadd.xlane.f32.xlu2 %v952_v56  ;;  %v837_v4 = vmax.f32 %v709_v40, 0.0 }
 0x1a4   : > { %v923_v21 = vmul.f32 %v2619_v0, %v792_v33  ;;  %v778_v3 = vmax.f32 %v650_v55, 0.0 }
 0x1a5   : > { %1074 = vadd.xlane.f32.xlu0 %v905_v63  ;;  %v2997_v23 = vpop.xlane.xlu1 %1066  ;;  %v922_v63 = vmul.f32 %v2619_v0, %v791_v13  ;;  %v649_v13 = vadd.f32 %v2609_v59, %v2741_v16 }
 0x1a6   : > { %v1027_v5 = vpop.xlane.xlu2 %1026 }
 0x1a7   : > { %v1265_v44 = vadd.f32 %v1027_v5, %v2868_v31  ;;  %v777_v54 = vmax.f32 %v649_v13, 0.0 }
 0x1a8   : > { %v3000_v51 = vpop.xlane.xlu0 %1016 }
 0x1a9   : > { %3809 = vst [vmem:[#allocation28_spill] sm:$0xff] %v3000_v51  ;;  %v1568_v56 = vperm.slane %v1265_v44, %v2872_v38  ;;  %v807_v51 = vmax.f32 %v679_v14, 0.0  ;;  %v724_v44 = vadd.f32 %v2632_v18, %v2847_v35  ;;  %v665_v14 = vadd.f32 %v2611_v60, %v2741_v16 }
 0x1aa   : > { %1228 = vadd.xlane.f32.xlu1 %v982_v53  ;;  %v635_v35 = vadd.f32 %v2607_v58, %v2891_v6  ;;  %v1598_v60 = vperm.slane %v1280_v36, %v2864_v26  ;;  %v1312_v36 = vadd.f32 %v2889_v2, %v2868_v31  ;;  %v3064_v2 = vmul.f32 %v2619_v0, %v823_v34 }
 0x1ab   : > { %v3011_v5 = vsel %vm1509_vm0, %v1568_v56, %v1567_v47  ;;  %1050 = vadd.xlane.f32.xlu2 %v893_v24  ;;  %v694_v47 = vadd.f32 %v2634_v19, %v2945_v62  ;;  %v836_v24 = vmax.f32 %v708_v57, 0.0  ;;  %v938_v42 = vmul.f32 %v2619_v0, %v807_v51 }
 0x1ac   : > { %v710_v51 = vadd.f32 %v2641_v27, %v2945_v62  ;;  %v763_v40 = vmax.f32 %v635_v35, 0.0  ;;  %v1268_v35 = vadd.f32 %v2866_v28, %v2868_v31 }
 0x1ad   : > { %1108 = vadd.xlane.f32.xlu0 %v922_v63  ;;  %v3020_v29 = vpop.xlane.xlu1 %1194  ;;  %v822_v57 = vmax.f32 %v694_v47, 0.0  ;;  %v967_v33 = vmul.f32 %v2619_v0, %v836_v24  ;;  %v3082_v24 = vadd.f32 %v2607_v58, %v2931_v25  ;;  %v3096_v58 = vadd.f32 %v2609_v59, %v2891_v6 }
 0x1ae   : > { %3810 = vst [vmem:[#allocation29_spill] sm:$0xff] %v3020_v29  ;;  %v1059_v53 = vpop.xlane.xlu2 %1058  ;;  %v852_v29 = vmax.f32 %v724_v44, 0.0 }
 0x1af   : > { %v1281_v56 = vadd.f32 %v1059_v53, %v2868_v31  ;;  %v793_v53 = vmax.f32 %v665_v14, 0.0  ;;  %v3061_v14 = vmul.f32 %v2619_v0, %v822_v57 }
 0x1b0   : > { %v3037_v63 = vpop.xlane.xlu0 %1004  ;;  %v983_v13 = vmul.f32 %v2619_v0, %v852_v29  ;;  %v838_v29 = vmax.f32 %v710_v51, 0.0  ;;  %v3090_v51 = vadd.s32 4294967256, %v2864_v26 }
 0x1b1   : > { %v1599_v46 = vperm.slane %v1281_v56, %v2872_v38  ;;  %v3058_v55 = vmul.f32 %v2619_v0, %v793_v53  ;;  %v1267_v56 = vadd.f32 %v2789_v7, %v2868_v31  ;;  %v1660_v53 = vperm.slane %v1312_v36, %v2864_v26 }
 0x1b2   : > { %1110 = vadd.xlane.f32.xlu1 %v923_v21  ;;  %v968_v21 = vmul.f32 %v2619_v0, %v837_v4  ;;  %v3068_v4 = vadd.s32 4294967280, %v2864_v26  ;;  %v3099_v7 = vadd.s32 4294967264, %v2864_v26 }
 0x1b3   : > { %v3044_v18 = vsel %vm1509_vm0, %v1599_v46, %v1598_v60  ;;  %1140 = vadd.xlane.f32.xlu2 %v938_v42  ;;  %v908_v60 = vmul.f32 %v2619_v0, %v777_v54  ;;  %v909_v42 = vmul.f32 %v2619_v0, %v778_v3  ;;  %v3071_v54 = vmul.f32 %v2619_v0, %v763_v40 }
 0x1b4   : > { %v3074_v3 = vadd.s32 4294967272, %v2864_v26 }
 0x1b5   : > { %1198 = vadd.xlane.f32.xlu0 %v967_v33  ;;  %v3051_v44 = vpop.xlane.xlu1 %1048 }
 0x1b6   : > { %v1123_v46 = vpop.xlane.xlu2 %1122  ;;  %v1572_v36 = vperm.slane %v1267_v56, %v3074_v3  ;;  %v1576_v56 = vperm.slane %v1269_v50, %v3090_v51 }
 0x1b7   : > { %v1313_v47 = vadd.f32 %v1123_v46, %v2868_v31  ;;  %v1516_v46 = vperm.slane %v1251_v9, %v3074_v3  ;;  %v1299_v9 = vadd.f32 %v2791_v8, %v2868_v31  ;;  %v3134_v8 = vadd.s32 4294967248, %v2864_v26 }
 0x1b8   : > { %v1029_v34 = vpop.xlane.xlu0 %1028 }
 0x1b9   : > { %v1661_v57 = vperm.slane %v1313_v47, %v2872_v38  ;;  %v1266_v33 = vadd.f32 %v1029_v34, %v2868_v31  ;;  %v1574_v47 = vperm.slane %v1268_v35, %v3099_v7  ;;  %v1300_v35 = vadd.f32 %v2893_v10, %v2868_v31 }
 0x1ba   : > { %1200 = vadd.xlane.f32.xlu1 %v968_v21  ;;  %v3109_v21 = vmul.f32 %v2619_v0, %v838_v29  ;;  %v1254_v10 = vadd.f32 %v3037_v63, %v2868_v31 }
 0x1bb   : > { %v3102_v28 = vsel %vm1509_vm0, %v1661_v57, %v1660_v53  ;;  %v1570_v40 = vperm.slane %v1266_v33, %v3068_v4  ;;  %1230 = vadd.xlane.f32.xlu2 %v983_v13  ;;  %v1252_v13 = vadd.f32 %v2851_v11, %v2868_v31  ;;  %v1691_v57 = vperm.slane %v1328_v37, %v2864_v26 }
 0x1bc   : > { %v1253_v11 = vadd.f32 %v2982_v49, %v2868_v31  ;;  %v1283_v37 = vadd.f32 %v2776_v52, %v2868_v31  ;;  %v1636_v52 = vperm.slane %v1300_v35, %v3099_v7 }
 0x1bd   : > { %v1571_v34 = vsel %vm1513_vm1, %v1570_v40, %v3011_v5  ;;  %1080 = vadd.xlane.f32.xlu0 %v908_v60  ;;  %v997_v53 = vpop.xlane.xlu1 %996  ;;  %v1520_v49 = vperm.slane %v1252_v13, %v3099_v7 }
 0x1be   : > { %v1573_v17 = vsel %vm1517_vm2, %v1572_v36, %v1571_v34  ;;  %v1250_v0 = vadd.f32 %v997_v53, %v2868_v31  ;;  %v1155_v29 = vpop.xlane.xlu2 %1154  ;;  %v1301_v34 = vadd.f32 %v2954_v30, %v2868_v31  ;;  %v1524_v13 = vperm.slane %v1253_v11, %v3090_v51 }
 0x1bf   : > { %v1329_v5 = vadd.f32 %v1155_v29, %v2868_v31  ;;  %v1575_v60 = vsel %vm1521_vm3, %v1574_v47, %v1573_v17 }
 0x1c0   : > { %v1512_v33 = vperm.slane %v1250_v0, %v3068_v4  ;;  %v1093_v50 = vpop.xlane.xlu0 %1092  ;;  %v3131_v40 = vsel %vm1525_vm4, %v1576_v56, %v1575_v60  ;;  %v1634_v56 = vperm.slane %v1299_v9, %v3074_v3  ;;  %v1638_v9 = vperm.slane %v1301_v34, %v3090_v51 }
 0x1c1   : > { %v1692_v36 = vperm.slane %v1329_v5, %v2872_v38  ;;  %v1298_v47 = vadd.f32 %v1093_v50, %v2868_v31 }
 0x1c2   : > { %v1514_v53 = vsel %vm1513_vm1, %v1512_v33, %v2887_v1  ;;  %1082 = vadd.xlane.f32.xlu1 %v909_v42  ;;  %v1284_v1 = vadd.f32 %v2913_v43, %v2868_v31  ;;  %v1360_v42 = vadd.f32 %v2965_v45, %v2868_v31  ;;  %v1285_v45 = vadd.f32 %v2997_v23, %v2868_v31 }
 0x1c3   : > { %v1518_v63 = vsel %vm1517_vm2, %v1516_v46, %v1514_v53  ;;  %v3150_v17 = vsel %vm1509_vm0, %v1692_v36, %v1691_v57  ;;  %v1632_v0 = vperm.slane %v1298_v47, %v3068_v4  ;;  %1112 = vadd.xlane.f32.xlu2 %v3058_v55  ;;  %v1528_v46 = vperm.slane %v1254_v10, %v3134_v8 }
 0x1c4   : > { %v1522_v30 = vsel %vm1521_vm3, %v1520_v49, %v1518_v63  ;;  %v1315_v33 = vadd.f32 %v2806_v22, %v2868_v31  ;;  %v1316_v23 = vadd.f32 %v2950_v12, %v2868_v31  ;;  %v1753_v47 = vperm.slane %v1360_v42, %v2864_v26 }
 0x1c5   : > { %v1633_v29 = vsel %vm1513_vm1, %v1632_v0, %v2911_v41  ;;  %1170 = vadd.xlane.f32.xlu0 %v3061_v14  ;;  %v1061_v55 = vpop.xlane.xlu1 %1060  ;;  %v1526_v43 = vsel %vm1525_vm4, %v1524_v13, %v1522_v30  ;;  %v1603_v14 = vperm.slane %v1283_v37, %v3074_v3  ;;  %v1605_v37 = vperm.slane %v1284_v1, %v3099_v7 }
 0x1c6   : > { %v1635_v35 = vsel %vm1517_vm2, %v1634_v56, %v1633_v29  ;;  %v1282_v5 = vadd.f32 %v1061_v55, %v2868_v31  ;;  %v1219_v60 = vpop.xlane.xlu2 %1218  ;;  %v3174_v41 = vsel %vm1529_vm5, %v1528_v46, %v1526_v43  ;;  %v1317_v22 = vadd.f32 %v2969_v32, %v2868_v31 }
 0x1c7   : > { %v1361_v57 = vadd.f32 %v1219_v60, %v2868_v31  ;;  %v1637_v11 = vsel %vm1521_vm3, %v1636_v52, %v1635_v35  ;;  %v680_v56 = vadd.f32 %v2613_v61, %v2663_v48  ;;  %v1607_v12 = vperm.slane %v1285_v45, %v3090_v51 }
 0x1c8   : > { %v1601_v50 = vperm.slane %v1282_v5, %v3068_v4  ;;  %v1125_v10 = vpop.xlane.xlu0 %1124  ;;  %v3181_v36 = vsel %vm1525_vm4, %v1638_v9, %v1637_v11  ;;  %v1665_v32 = vperm.slane %v1315_v33, %v3074_v3  ;;  %v1331_v13 = vadd.f32 %v2804_v20, %v2868_v31 }
 0x1c9   : > { %v1754_v49 = vperm.slane %v1361_v57, %v2872_v38  ;;  %v1314_v34 = vadd.f32 %v1125_v10, %v2868_v31  ;;  %v1667_v30 = vperm.slane %v1316_v23, %v3099_v7  ;;  %v1669_v46 = vperm.slane %v1317_v22, %v3090_v51 }
 0x1ca   : > { %v1602_v53 = vsel %vm1513_vm1, %v1601_v50, %v3044_v18  ;;  %1172 = vadd.xlane.f32.xlu1 %v3064_v2  ;;  %v764_v18 = vmax.f32 %v3082_v24, 0.0  ;;  %v779_v2 = vmax.f32 %v3096_v58, 0.0  ;;  %v1332_v24 = vadd.f32 %v2980_v39, %v2868_v31  ;;  %v3227_v39 = vld [vmem:[%s3772_s6] ss:$0 sm:$0xff] }
 0x1cb   : > { %v1604_v63 = vsel %vm1517_vm2, %v1603_v14, %v1602_v53  ;;  %v3199_v38 = vsel %vm1509_vm0, %v1754_v49, %v1753_v47  ;;  %v1663_v0 = vperm.slane %v1314_v34, %v3068_v4  ;;  %1202 = vadd.xlane.f32.xlu2 %v3109_v21  ;;  %v808_v9 = vmax.f32 %v680_v56, 0.0  ;;  %v3811_v34 = vld [vmem:[#allocation14_spill] sm:$0xff] }
 0x1cc   : > { %v1606_v52 = vsel %vm1521_vm3, %v1605_v37, %v1604_v63  ;;  %v895_v60 = vmul.f32 %v3227_v39, %v764_v18  ;;  %v696_v45 = vadd.f32 %v2634_v19, %v2663_v48  ;;  %v1696_v57 = vperm.slane %v1331_v13, %v3074_v3 }
 0x1cd   : > { %v1664_v1 = vsel %vm1513_vm1, %v1663_v0, %v3102_v28  ;;  %1052 = vadd.xlane.f32.xlu0 %v3071_v54  ;;  %v1157_v42 = vpop.xlane.xlu1 %1156  ;;  %v1608_v21 = vsel %vm1525_vm4, %v1607_v12, %v1606_v52  ;;  %v681_v54 = vadd.f32 %v2613_v61, %v2741_v16  ;;  %v910_v33 = vmul.f32 %v3227_v39, %v779_v2  ;;  %v3812_v52 = vld [vmem:[#allocation18_spill] sm:$0xff] }
 0x1ce   : > { %v1666_v58 = vsel %vm1517_vm2, %v1665_v32, %v1664_v1  ;;  %v1330_v29 = vadd.f32 %v1157_v42, %v2868_v31  ;;  %v1163_v20 = vpop.xlane.xlu2 %1162  ;;  %v1698_v50 = vperm.slane %v1332_v24, %v3099_v7  ;;  %v939_v49 = vmul.f32 %v3227_v39, %v808_v9 }
 0x1cf   : > { %v1333_v55 = vadd.f32 %v1163_v20, %v2868_v31  ;;  %v1668_v28 = vsel %vm1521_vm3, %v1667_v30, %v1666_v58  ;;  %v725_v37 = vadd.f32 %v3811_v34, %v2896_v15  ;;  %v809_v53 = vmax.f32 %v681_v54, 0.0  ;;  %v3814_v20 = vld [vmem:[#allocation29_spill] sm:$0xff] }
 0x1d0   : > { %v1694_v35 = vperm.slane %v1330_v29, %v3068_v4  ;;  %v1037_v5 = vpop.xlane.xlu0 %1036  ;;  %v1670_v43 = vsel %vm1525_vm4, %v1669_v46, %v1668_v28  ;;  %v824_v63 = vmax.f32 %v696_v45, 0.0  ;;  %v652_v15 = vadd.f32 %v2609_v59, %v2931_v25  ;;  %v3813_v46 = vld [vmem:[#allocation21_spill] sm:$0xff] }
 0x1d1   : > { %v1700_v11 = vperm.slane %v1333_v55, %v3090_v51  ;;  %v1270_v14 = vadd.f32 %v1037_v5, %v2868_v31  ;;  %v853_v2 = vmax.f32 %v725_v37, 0.0  ;;  %v1347_v13 = vadd.f32 %v3812_v52, %v2868_v31  ;;  %v3816_v5 = vld [vmem:[#allocation12_spill] sm:$0xff] }
 0x1d2   : > { %v1695_v10 = vsel %vm1513_vm1, %v1694_v35, %v3150_v17  ;;  %1054 = vadd.xlane.f32.xlu1 %v895_v60  ;;  %v726_v42 = vadd.f32 %v3811_v34, %v2945_v62  ;;  %v1348_v24 = vadd.f32 %v3813_v46, %v2868_v31  ;;  %v955_v59 = vmul.f32 %v3227_v39, %v824_v63  ;;  %v3815_v35 = vld [vmem:[#allocation19_spill] sm:$0xff] }
 0x1d3   : > { %v1697_v23 = vsel %vm1517_vm2, %v1696_v57, %v1695_v10  ;;  %v1578_v47 = vperm.slane %v1270_v14, %v3134_v8  ;;  %1084 = vadd.xlane.f32.xlu2 %v910_v33  ;;  %v1349_v55 = vadd.f32 %v3814_v20, %v2868_v31  ;;  %v984_v54 = vmul.f32 %v3227_v39, %v853_v2  ;;  %v3817_v14 = vld [vmem:[#allocation24_spill] sm:$0xff] }
 0x1d4   : > { %v1699_v22 = vsel %vm1521_vm3, %v1698_v50, %v1697_v23  ;;  %v666_v60 = vadd.f32 %v3816_v5, %v3815_v35  ;;  %v1727_v45 = vperm.slane %v1347_v13, %v3074_v3  ;;  %v854_v57 = vmax.f32 %v726_v42, 0.0 }
 0x1d5   : > { %v3247_v56 = vsel %vm1525_vm4, %v1700_v11, %v1699_v22  ;;  %v3251_v17 = vsel %vm1529_vm5, %v1578_v47, %v3131_v40  ;;  %1142 = vadd.xlane.f32.xlu0 %v939_v49  ;;  %v1133_v12 = vpop.xlane.xlu1 %1132  ;;  %v940_v40 = vmul.f32 %v3227_v39, %v809_v53  ;;  %v1729_v11 = vperm.slane %v1348_v24, %v3099_v7  ;;  %v3818_v22 = vld [vmem:[#allocation16_spill] sm:$0xff] }
 0x1d6   : > { %v1318_v0 = vadd.f32 %v1133_v12, %v2868_v31  ;;  %v1069_v32 = vpop.xlane.xlu2 %1068  ;;  %v1731_v50 = vperm.slane %v1349_v55, %v3090_v51  ;;  %v794_v49 = vmax.f32 %v666_v60, 0.0  ;;  %v1363_v53 = vadd.f32 %v3818_v22, %v2868_v31 }
 0x1d7   : > { %v1286_v18 = vadd.f32 %v1069_v32, %v2868_v31  ;;  %v985_v63 = vmul.f32 %v3227_v39, %v854_v57  ;;  %v682_v32 = vadd.f32 %v2613_v61, %v3815_v35  ;;  %v697_v52 = vadd.f32 %v2634_v19, %v2741_v16 }
 0x1d8   : > { %v1671_v30 = vperm.slane %v1318_v0, %v3134_v8  ;;  %v1189_v1 = vpop.xlane.xlu0 %1188  ;;  %v1758_v46 = vperm.slane %v1363_v53, %v3074_v3  ;;  %v3309_v24 = vadd.s32 4294967240, %v2864_v26  ;;  %vm1786_vm0 = vcmask 1042434  }
 0x1d9   : > { %v1609_v58 = vperm.slane %v1286_v18, %v3134_v8  ;;  %v1346_v29 = vadd.f32 %v1189_v1, %v2868_v31  ;;  %v925_v1 = vmul.f32 %v3227_v39, %v794_v49 }
 0x1da   : > { %v3271_v9 = vsel %vm1529_vm5, %v1671_v30, %v1670_v43  ;;  %1144 = vadd.xlane.f32.xlu1 %v940_v40  ;;  %v3819_v40 = vld [vmem:[#allocation13_spill] sm:$0xff] }
 0x1db   : > { %v3274_v28 = vsel %vm1529_vm5, %v1609_v58, %v1608_v21  ;;  %v1725_v62 = vperm.slane %v1346_v29, %v3068_v4  ;;  %1174 = vadd.xlane.f32.xlu2 %v955_v59  ;;  %v780_v21 = vmax.f32 %v652_v15, 0.0  ;;  %v711_v42 = vadd.f32 %v2641_v27, %v3819_v40 }
 0x1dc   : > { %v810_v58 = vmax.f32 %v682_v32, 0.0 }
 0x1dd   : > { %v1726_v43 = vsel %vm1513_vm1, %v1725_v62, %v3817_v14  ;;  %1232 = vadd.xlane.f32.xlu0 %v984_v54  ;;  %v3284_v33 = vpop.xlane.xlu1 %1018  ;;  %v911_v15 = vmul.f32 %v3227_v39, %v780_v21  ;;  %v839_v3 = vmax.f32 %v711_v42, 0.0 }
 0x1de   : > { %v1728_v10 = vsel %vm1517_vm2, %v1727_v45, %v1726_v43  ;;  %v1101_v23 = vpop.xlane.xlu2 %1100  ;;  %v941_v45 = vmul.f32 %v3227_v39, %v810_v58  ;;  %v668_v43 = vadd.f32 %v3816_v5, %v2931_v25  ;;  %v712_v58 = vadd.f32 %v2641_v27, %v2663_v48 }
 0x1df   : > { %v1302_v47 = vadd.f32 %v1101_v23, %v2868_v31  ;;  %v1730_v37 = vsel %vm1521_vm3, %v1729_v11, %v1728_v10  ;;  %v970_v23 = vmul.f32 %v3227_v39, %v839_v3  ;;  %v3820_v3 = vld [vmem:[#allocation23_spill] sm:$0xff] }
 0x1e0   : > { %v1221_v12 = vpop.xlane.xlu0 %1220  ;;  %v1732_v0 = vsel %vm1525_vm4, %v1731_v50, %v1730_v37  ;;  %v796_v22 = vmax.f32 %v668_v43, 0.0 }
 0x1e1   : > { %v1640_v18 = vperm.slane %v1302_v47, %v3134_v8  ;;  %v1362_v2 = vadd.f32 %v1221_v12, %v2868_v31  ;;  %v667_v47 = vadd.f32 %v3816_v5, %v2891_v6  ;;  %v698_v5 = vadd.f32 %v2634_v19, %v3815_v35 }
 0x1e2   : > { %1234 = vadd.xlane.f32.xlu1 %v985_v63 }
 0x1e3   : > { %v1641_v13 = vsel %vm1529_vm5, %v1640_v18, %v3181_v36  ;;  %v1756_v30 = vperm.slane %v1362_v2, %v3068_v4  ;;  %1086 = vadd.xlane.f32.xlu2 %v911_v15  ;;  %v825_v36 = vmax.f32 %v697_v52, 0.0  ;;  %v927_v52 = vmul.f32 %v3227_v39, %v796_v22 }
 0x1e5   : > { %v1757_v29 = vsel %vm1513_vm1, %v1756_v30, %v3199_v38  ;;  %1114 = vadd.xlane.f32.xlu0 %v925_v1  ;;  %v1007_v59 = vpop.xlane.xlu1 %1006  ;;  %v727_v38 = vadd.f32 %v3811_v34, %v3819_v40  ;;  %v956_v14 = vmul.f32 %v3227_v39, %v825_v36  ;;  %v713_v30 = vadd.f32 %v2641_v27, %v2741_v16 }
 0x1e6   : > { %v3314_v4 = vsel %vm1517_vm2, %v1758_v46, %v1757_v29  ;;  %v1255_v20 = vadd.f32 %v1007_v59, %v2868_v31  ;;  %v1197_v55 = vpop.xlane.xlu2 %1196  ;;  %v826_v29 = vmax.f32 %v698_v5, 0.0  ;;  %vm1788_vm1 = vcmask 1043459  }
 0x1e7   : > { %v1350_v62 = vadd.f32 %v1197_v55, %v2868_v31  ;;  %v855_v49 = vmax.f32 %v727_v38, 0.0  ;;  %v684_v38 = vadd.f32 %v2613_v61, %v2931_v25  ;;  %vm1790_vm2 = vcmask 1044484  }
 0x1e8   : > { %v1532_v54 = vperm.slane %v1255_v20, %v3309_v24  ;;  %v1165_v60 = vpop.xlane.xlu0 %1164  ;;  %v841_v20 = vmax.f32 %v713_v30, 0.0 }
 0x1e9   : > { %v1733_v57 = vperm.slane %v1350_v62, %v3134_v8  ;;  %v1334_v11 = vadd.f32 %v1165_v60, %v2868_v31  ;;  %v986_v2 = vmul.f32 %v3227_v39, %v855_v49  ;;  %v840_v62 = vmax.f32 %v712_v58, 0.0 }
 0x1ea   : > { %v3329_v21 = vsel %vm1533_vm6, %v1532_v54, %v3174_v41  ;;  %1146 = vadd.xlane.f32.xlu1 %v941_v45  ;;  %v1364_v54 = vadd.f32 %v3820_v3, %v2868_v31  ;;  %v972_v43 = vmul.f32 %v3227_v39, %v841_v20 }
 0x1eb   : > { %v3332_v50 = vsel %vm1529_vm5, %v1733_v57, %v1732_v0  ;;  %v1702_v10 = vperm.slane %v1334_v11, %v3134_v8  ;;  %1176 = vadd.xlane.f32.xlu2 %v956_v14  ;;  %v795_v0 = vmax.f32 %v667_v47, 0.0  ;;  %v3821_v57 = vld [vmem:[#allocation27_spill] sm:$0xff]  ;;  %v971_v49 = vmul.f32 %v3227_v39, %v840_v62 }
 0x1ec   : > { %v1365_v11 = vadd.f32 %v3821_v57, %v2868_v31  ;;  %v1760_v22 = vperm.slane %v1364_v54, %v3099_v7  ;;  %v730_v62 = vadd.f32 %v3811_v34, %v3815_v35 }
 0x1ed   : > { %v3340_v37 = vsel %vm1529_vm5, %v1702_v10, %v3247_v56  ;;  %1204 = vadd.xlane.f32.xlu0 %v970_v23  ;;  %v1039_v41 = vpop.xlane.xlu1 %1038  ;;  %v926_v46 = vmul.f32 %v3227_v39, %v795_v0  ;;  %v699_v10 = vadd.f32 %v2634_v19, %v2891_v6 }
 0x1ee   : > { %v1271_v53 = vadd.f32 %v1039_v41, %v2868_v31  ;;  %v1135_v12 = vpop.xlane.xlu2 %1134  ;;  %v683_v41 = vadd.f32 %v2613_v61, %v2891_v6 }
 0x1ef   : > { %v1319_v63 = vadd.f32 %v1135_v12, %v2868_v31  ;;  %v1762_v12 = vperm.slane %v1365_v11, %v3090_v51  ;;  %v827_v0 = vmax.f32 %v699_v10, 0.0 }
 0x1f0   : > { %v1580_v32 = vperm.slane %v1271_v53, %v3309_v24  ;;  %v1103_v18 = vpop.xlane.xlu0 %1102  ;;  %v812_v53 = vmax.f32 %v684_v38, 0.0  ;;  %v811_v61 = vmax.f32 %v683_v41, 0.0  ;;  %v3822_v41 = vld [vmem:[#allocation20_spill] sm:$0xff] }
 0x1f1   : > { %v1673_v56 = vperm.slane %v1319_v63, %v3309_v24  ;;  %v1303_v15 = vadd.f32 %v1103_v18, %v2868_v31 }
 0x1f2   : > { %v1581_v1 = vsel %vm1533_vm6, %v1580_v32, %v3251_v17  ;;  %1236 = vadd.xlane.f32.xlu1 %v986_v2  ;;  %v1761_v2 = vsel %vm1521_vm3, %v1760_v22, %v3314_v4  ;;  %v958_v4 = vmul.f32 %v3227_v39, %v827_v0  ;;  %v1274_v22 = vadd.f32 %v3822_v41, %v2868_v31 }
 0x1f3   : > { %v1674_v40 = vsel %vm1533_vm6, %v1673_v56, %v3271_v9  ;;  %v1642_v42 = vperm.slane %v1303_v15, %v3309_v24  ;;  %1118 = vadd.xlane.f32.xlu2 %v927_v52  ;;  %v3368_v9 = vadd.s32 4294967232, %v2864_v26  ;;  %v3398_v7 = vsel %vm1525_vm4, %v1762_v12, %v1761_v2  ;;  %v3823_v2 = vld [vmem:[#allocation22_spill] sm:$0xff] }
 0x1f4   : > { %v943_v15 = vmul.f32 %v3227_v39, %v812_v53  ;;  %v729_v52 = vadd.f32 %v3811_v34, %v2741_v16  ;;  %v3447_v53 = vadd.s32 4294967224, %v2864_v26  ;;  %v732_v12 = vadd.f32 %v3811_v34, %v2931_v25 }
 0x1f5   : > { %v3362_v59 = vsel %vm1533_vm6, %v1642_v42, %v1641_v13  ;;  %1116 = vadd.xlane.f32.xlu0 %v926_v46  ;;  %v1071_v36 = vpop.xlane.xlu1 %1070  ;;  %v957_v13 = vmul.f32 %v3227_v39, %v826_v29  ;;  %v700_v42 = vadd.f32 %v2634_v19, %v2931_v25  ;;  %v942_v29 = vmul.f32 %v3227_v39, %v811_v61 }
 0x1f6   : > { %v1287_v17 = vadd.f32 %v1071_v36, %v2868_v31  ;;  %v3365_v55 = vpop.xlane.xlu2 %1020  ;;  %v728_v36 = vadd.f32 %v3811_v34, %v2663_v48  ;;  %v857_v20 = vmax.f32 %v729_v52, 0.0  ;;  %v1276_v52 = vadd.f32 %v3051_v44, %v2868_v31 }
 0x1f7   : > { %vm1792_vm3 = vcmask 1045509   ;;  %vm1794_vm4 = vcmask 1046534  }
 0x1f8   : > { %v1611_v60 = vperm.slane %v1287_v17, %v3309_v24  ;;  %v1041_v45 = vpop.xlane.xlu0 %1040  ;;  %v828_v17 = vmax.f32 %v700_v42, 0.0  ;;  %v988_v38 = vmul.f32 %v3227_v39, %v857_v20 }
 0x1f9   : > { %v1272_v14 = vadd.f32 %v1041_v45, %v2868_v31  ;;  %v856_v45 = vmax.f32 %v728_v36, 0.0 }
 0x1fa   : > { %v1612_v23 = vsel %vm1533_vm6, %v1611_v60, %v3274_v28  ;;  %1178 = vadd.xlane.f32.xlu1 %v957_v13  ;;  %v714_v60 = vadd.f32 %v2641_v27, %v3815_v35  ;;  %v959_v11 = vmul.f32 %v3227_v39, %v828_v17 }
 0x1fb   : > { %v1582_v47 = vperm.slane %v1272_v14, %v3368_v9  ;;  %1208 = vadd.xlane.f32.xlu2 %v972_v43  ;;  %v858_v14 = vmax.f32 %v730_v62, 0.0 }
 0x1fc   : > { %v842_v35 = vmax.f32 %v714_v60, 0.0 }
 0x1fd   : > { %v3391_v63 = vsel %vm1537_vm7, %v1582_v47, %v1581_v1  ;;  %1206 = vadd.xlane.f32.xlu0 %v971_v49  ;;  %v1167_v28 = vpop.xlane.xlu1 %1166  ;;  %v987_v49 = vmul.f32 %v3227_v39, %v856_v45  ;;  %v860_v45 = vmax.f32 %v732_v12, 0.0  ;;  %v3827_v12 = vld [vmem:[#allocation17_spill] sm:$0xff] }
 0x1fe   : > { %v1335_v32 = vadd.f32 %v1167_v28, %v2868_v31  ;;  %v1009_v18 = vpop.xlane.xlu2 %1008  ;;  %v3452_v28 = vadd.s32 4294967216, %v2864_v26 }
 0x1ff   : > { %v1256_v5 = vadd.f32 %v1009_v18, %v2868_v31  ;;  %v3459_v18 = vadd.s32 4294967208, %v2864_v26 }
 0x200   : > { %v1704_v51 = vperm.slane %v1335_v32, %v3309_v24  ;;  %v1137_v56 = vpop.xlane.xlu0 %1136  ;;  %v715_v32 = vadd.f32 %v2641_v27, %v2891_v6 }
 0x201   : > { %v1536_v30 = vperm.slane %v1256_v5, %v3368_v9  ;;  %v1320_v1 = vadd.f32 %v1137_v56, %v2868_v31  ;;  %v1275_v5 = vadd.f32 %v3823_v2, %v2868_v31  ;;  %v3824_v56 = vld [vmem:[#allocation15_spill] sm:$0xff]  ;;  %v991_v2 = vmul.f32 %v3227_v39, %v860_v45 }
 0x202   : > { %v3411_v46 = vsel %vm1533_vm6, %v1704_v51, %v3340_v37  ;;  %1150 = vadd.xlane.f32.xlu1 %v943_v15  ;;  %v973_v51 = vmul.f32 %v3227_v39, %v842_v35  ;;  %v1258_v15 = vadd.f32 %v3824_v56, %v2868_v31  ;;  %v731_v56 = vadd.f32 %v3811_v34, %v2891_v6 }
 0x203   : > { %v3415_v58 = vsel %vm1537_vm7, %v1536_v30, %v3329_v21  ;;  %v1675_v16 = vperm.slane %v1320_v1, %v3368_v9  ;;  %1180 = vadd.xlane.f32.xlu2 %v958_v4  ;;  %v716_v21 = vadd.f32 %v2641_v27, %v2931_v25  ;;  %v1586_v30 = vperm.slane %v1274_v22, %v3452_v28 }
 0x204   : > { %v3472_v1 = vadd.s32 4294967200, %v2864_v26  ;;  %v1588_v20 = vperm.slane %v1275_v5, %v3459_v18  ;;  %v843_v22 = vmax.f32 %v715_v32, 0.0  ;;  %v3828_v5 = vld [vmem:[#allocation26_spill] sm:$0xff] }
 0x205   : > { %v3422_v19 = vsel %vm1537_vm7, %v1675_v16, %v1674_v40  ;;  %1148 = vadd.xlane.f32.xlu0 %v942_v29  ;;  %v1105_v37 = vpop.xlane.xlu1 %1104  ;;  %v844_v43 = vmax.f32 %v716_v21, 0.0  ;;  %v3825_v16 = vld [vmem:[#allocation25_spill] sm:$0xff] }
 0x206   : > { %v1304_v3 = vadd.f32 %v1105_v37, %v2868_v31  ;;  %v1073_v54 = vpop.xlane.xlu2 %1072  ;;  %v1259_v29 = vadd.f32 %v3825_v16, %v2868_v31  ;;  %v3826_v37 = vld [vmem:[#allocation28_spill] sm:$0xff]  ;;  %v1590_v21 = vperm.slane %v1276_v52, %v3472_v1 }
 0x207   : > { %v1288_v48 = vadd.f32 %v1073_v54, %v2868_v31  ;;  %v975_v0 = vmul.f32 %v3227_v39, %v844_v43  ;;  %v1260_v17 = vadd.f32 %v3826_v37, %v2868_v31  ;;  %v1262_v37 = vadd.f32 %v3365_v55, %v2868_v31 }
 0x208   : > { %v1644_v40 = vperm.slane %v1304_v3, %v3368_v9  ;;  %v3433_v13 = vpop.xlane.xlu0 %1022 }
 0x209   : > { %v1613_v57 = vperm.slane %v1288_v48, %v3368_v9  ;;  %v1544_v48 = vperm.slane %v1258_v15, %v3452_v28 }
 0x20a   : > { %v1645_v10 = vsel %vm1537_vm7, %v1644_v40, %v3362_v59  ;;  %1240 = vadd.xlane.f32.xlu1 %v988_v38  ;;  %v1548_v38 = vperm.slane %v1259_v29, %v3459_v18  ;;  %v3527_v29 = vadd.s32 4294967192, %v2864_v26 }
 0x20b   : > { %v3441_v47 = vsel %vm1537_vm7, %v1613_v57, %v1612_v23  ;;  %1182 = vadd.xlane.f32.xlu2 %v959_v11  ;;  %v989_v23 = vmul.f32 %v3227_v39, %v858_v14  ;;  %v1552_v14 = vperm.slane %v1260_v17, %v3472_v1 }
 0x20d   : > { %1238 = vadd.xlane.f32.xlu0 %v987_v49  ;;  %v1043_v59 = vpop.xlane.xlu1 %1042 }
 0x20e   : > { %v1273_v25 = vadd.f32 %v1043_v59, %v2868_v31  ;;  %v1107_v61 = vpop.xlane.xlu2 %1106  ;;  %v1290_v59 = vadd.f32 %v3827_v12, %v2868_v31 }
 0x20f   : > { %v1305_v27 = vadd.f32 %v1107_v61, %v2868_v31 }
 0x210   : > { %v1584_v4 = vperm.slane %v1273_v25, %v3447_v53  ;;  %v1011_v42 = vpop.xlane.xlu0 %1010  ;;  %v1291_v25 = vadd.f32 %v3828_v5, %v2868_v31 }
 0x211   : > { %v1646_v36 = vperm.slane %v1305_v27, %v3447_v53  ;;  %v1257_v44 = vadd.f32 %v1011_v42, %v2868_v31  ;;  %v974_v27 = vmul.f32 %v3227_v39, %v843_v22 }
 0x212   : > { %v1585_v62 = vsel %vm1541_vm8, %v1584_v4, %v3391_v63  ;;  %1242 = vadd.xlane.f32.xlu1 %v989_v23  ;;  %v1619_v4 = vperm.slane %v1291_v25, %v3459_v18 }
 0x213   : > { %v1587_v3 = vsel %vm1545_vm9, %v1586_v30, %v1585_v62  ;;  %v3487_v54 = vsel %vm1541_vm8, %v1646_v36, %v1645_v10  ;;  %v1540_v60 = vperm.slane %v1257_v44, %v3447_v53  ;;  %1214 = vadd.xlane.f32.xlu2 %v975_v0  ;;  %v1617_v30 = vperm.slane %v1290_v59, %v3452_v28 }
 0x214   : > { %v1589_v40 = vsel %vm1549_vm10, %v1588_v20, %v1587_v3  ;;  %v1261_v36 = vadd.f32 %v3284_v33, %v2868_v31  ;;  %v1263_v3 = vadd.f32 %v3433_v13, %v2868_v31 }
 0x215   : > { %v1542_v63 = vsel %vm1541_vm8, %v1540_v60, %v3415_v58  ;;  %1210 = vadd.xlane.f32.xlu0 %v973_v51  ;;  %v1139_v57 = vpop.xlane.xlu1 %1138  ;;  %v1591_v11 = vsel %vm1553_vm11, %v1590_v21, %v1589_v40  ;;  %v3540_v21 = vadd.s32 4294967176, %v2864_v26 }
 0x216   : > { %v1546_v43 = vsel %vm1545_vm9, %v1544_v48, %v1542_v63  ;;  %v1321_v10 = vadd.f32 %v1139_v57, %v2868_v31  ;;  %v1169_v35 = vpop.xlane.xlu2 %1168  ;;  %v1556_v55 = vperm.slane %v1261_v36, %v3527_v29 }
 0x217   : > { %v1550_v49 = vsel %vm1549_vm10, %v1548_v38, %v1546_v43  ;;  %v1336_v41 = vadd.f32 %v1169_v35, %v2868_v31  ;;  %v1564_v13 = vperm.slane %v1263_v3, %v3540_v21 }
 0x218   : > { %v1554_v58 = vsel %vm1553_vm11, %v1552_v14, %v1550_v49  ;;  %v1677_v23 = vperm.slane %v1321_v10, %v3447_v53  ;;  %v1075_v0 = vpop.xlane.xlu0 %1074 }
 0x219   : > { %v1706_v61 = vperm.slane %v1336_v41, %v3368_v9  ;;  %v1289_v51 = vadd.f32 %v1075_v0, %v2868_v31 }
 0x21a   : > { %v1678_v32 = vsel %vm1541_vm8, %v1677_v23, %v3422_v19  ;;  %1246 = vadd.xlane.f32.xlu1 %v991_v2 }
 0x21b   : > { %v3516_v15 = vsel %vm1537_vm7, %v1706_v61, %v3411_v46  ;;  %v1615_v52 = vperm.slane %v1289_v51, %v3447_v53  ;;  %v859_v46 = vmax.f32 %v731_v56, 0.0 }
 0x21d   : > { %v1616_v42 = vsel %vm1541_vm8, %v1615_v52, %v3441_v47  ;;  %1212 = vadd.xlane.f32.xlu0 %v974_v27  ;;  %v1229_v19 = vpop.xlane.xlu1 %1228  ;;  %v3534_v47 = vadd.s32 4294967184, %v2864_v26  ;;  %v990_v45 = vmul.f32 %v3227_v39, %v859_v46 }
 0x21e   : > { %v1618_v16 = vsel %vm1545_vm9, %v1617_v30, %v1616_v42  ;;  %v1366_v6 = vadd.f32 %v1229_v19, %v2868_v31  ;;  %v1051_v34 = vpop.xlane.xlu2 %1050 }
 0x21f   : > { %v1277_v44 = vadd.f32 %v1051_v34, %v2868_v31  ;;  %v1620_v20 = vsel %vm1549_vm10, %v1619_v4, %v1618_v16  ;;  %v1560_v40 = vperm.slane %v1262_v37, %v3534_v47 }
 0x220   : > { %v1764_v17 = vperm.slane %v1366_v6, %v3134_v8  ;;  %v1109_v62 = vpop.xlane.xlu0 %1108 }
 0x221   : > { %v1592_v33 = vperm.slane %v1277_v44, %v3527_v29  ;;  %v1306_v60 = vadd.f32 %v1109_v62, %v2868_v31 }
 0x222   : > { %v1765_v48 = vsel %vm1529_vm5, %v1764_v17, %v3398_v7  ;;  %v1558_v7 = vsel %vm1557_vm12, %v1556_v55, %v1554_v58  ;;  %vm1796_vm5 = vcmask 1047559  }
 0x223   : > { %v1593_v8 = vsel %vm1557_vm12, %v1592_v33, %v1591_v11  ;;  %v1648_v26 = vperm.slane %v1306_v60, %v3452_v28  ;;  %v1562_v11 = vsel %vm1561_vm13, %v1560_v40, %v1558_v7 }
 0x224   : > { %v1566_v43 = vsel %vm1565_vm14, %v1564_v13, %v1562_v11 }
 0x225   : > { %v1649_v38 = vsel %vm1545_vm9, %v1648_v26, %v3487_v54  ;;  %1244 = vadd.xlane.f32.xlu0 %v990_v45  ;;  %v1111_v63 = vpop.xlane.xlu1 %1110 }
 0x226   : > { %v1307_v39 = vadd.f32 %v1111_v63, %v2868_v31  ;;  %v1141_v57 = vpop.xlane.xlu2 %1140 }
 0x227   : > { %v1322_v14 = vadd.f32 %v1141_v57, %v2868_v31 }
 0x228   : > { %v1650_v10 = vperm.slane %v1307_v39, %v3459_v18  ;;  %v1199_v35 = vpop.xlane.xlu0 %1198 }
 0x229   : > { %v1679_v49 = vperm.slane %v1322_v14, %v3452_v28  ;;  %v1351_v54 = vadd.f32 %v1199_v35, %v2868_v31 }
 0x22a   : > { %v1651_v41 = vsel %vm1549_vm10, %v1650_v10, %v1649_v38 }
 0x22b   : > { %v1680_v22 = vsel %vm1545_vm9, %v1679_v49, %v1678_v32  ;;  %v1735_v12 = vperm.slane %v1351_v54, %v3309_v24 }
 0x22d   : > { %v1736_v59 = vsel %vm1533_vm6, %v1735_v12, %v3332_v50  ;;  %v1201_v58 = vpop.xlane.xlu1 %1200 }
 0x22e   : > { %v1352_v23 = vadd.f32 %v1201_v58, %v2868_v31  ;;  %v1231_v0 = vpop.xlane.xlu2 %1230 }
 0x22f   : > { %v1367_v2 = vadd.f32 %v1231_v0, %v2868_v31 }
 0x230   : > { %v1737_v5 = vperm.slane %v1352_v23, %v3368_v9  ;;  %v1081_v25 = vpop.xlane.xlu0 %1080 }
 0x231   : > { %v1766_v61 = vperm.slane %v1367_v2, %v3309_v24  ;;  %v1292_v51 = vadd.f32 %v1081_v25, %v2868_v31 }
 0x232   : > { %v1738_v32 = vsel %vm1537_vm7, %v1737_v5, %v1736_v59 }
 0x233   : > { %v1767_v56 = vsel %vm1533_vm6, %v1766_v61, %v1765_v48  ;;  %v1621_v50 = vperm.slane %v1292_v51, %v3472_v1 }
 0x235   : > { %v1622_v52 = vsel %vm1553_vm11, %v1621_v50, %v1620_v20  ;;  %v1083_v27 = vpop.xlane.xlu1 %1082 }
 0x236   : > { %v1293_v30 = vadd.f32 %v1083_v27, %v2868_v31  ;;  %v1113_v4 = vpop.xlane.xlu2 %1112 }
 0x237   : > { %v1308_v42 = vadd.f32 %v1113_v4, %v2868_v31 }
 0x238   : > { %v1623_v19 = vperm.slane %v1293_v30, %v3527_v29  ;;  %v1171_v24 = vpop.xlane.xlu0 %1170 }
 0x239   : > { %v1652_v16 = vperm.slane %v1308_v42, %v3472_v1  ;;  %v1337_v6 = vadd.f32 %v1171_v24, %v2868_v31 }
 0x23a   : > { %v1624_v34 = vsel %vm1557_vm12, %v1623_v19, %v1622_v52 }
 0x23b   : > { %v1653_v46 = vsel %vm1553_vm11, %v1652_v16, %v1651_v41  ;;  %v1708_v36 = vperm.slane %v1337_v6, %v3447_v53 }
 0x23d   : > { %v1709_v44 = vsel %vm1541_vm8, %v1708_v36, %v3516_v15  ;;  %v1173_v20 = vpop.xlane.xlu1 %1172 }
 0x23e   : > { %v1338_v37 = vadd.f32 %v1173_v20, %v2868_v31  ;;  %v1203_v17 = vpop.xlane.xlu2 %1202 }
 0x23f   : > { %v1353_v62 = vadd.f32 %v1203_v17, %v2868_v31 }
 0x240   : > { %v1710_v3 = vperm.slane %v1338_v37, %v3452_v28  ;;  %v1053_v33 = vpop.xlane.xlu0 %1052 }
 0x241   : > { %v1739_v60 = vperm.slane %v1353_v62, %v3447_v53  ;;  %v1278_v48 = vadd.f32 %v1053_v33, %v2868_v31 }
 0x242   : > { %v3598_v45 = vsel %vm1545_vm9, %v1710_v3, %v1709_v44 }
 0x243   : > { %v3601_v55 = vsel %vm1541_vm8, %v1739_v60, %v1738_v32  ;;  %v1594_v15 = vperm.slane %v1278_v48, %v3534_v47 }
 0x245   : > { %v1595_v26 = vsel %vm1561_vm13, %v1594_v15, %v1593_v8  ;;  %v1055_v40 = vpop.xlane.xlu1 %1054 }
 0x246   : > { %v1279_v13 = vadd.f32 %v1055_v40, %v2868_v31  ;;  %v1085_v38 = vpop.xlane.xlu2 %1084 }
 0x247   : > { %v1294_v41 = vadd.f32 %v1085_v38, %v2868_v31 }
 0x248   : > { %v1596_v63 = vperm.slane %v1279_v13, %v3540_v21  ;;  %v1143_v7 = vpop.xlane.xlu0 %1142 }
 0x249   : > { %v1323_v39 = vadd.f32 %v1143_v7, %v2868_v31 }
 0x24a   : > { %v1597_v57 = vsel %vm1565_vm14, %v1596_v63, %v1595_v26 }
 0x24b   : > { %v1785_v11 = vsel %vm1784_vm15, %v1597_v57, %v1566_v43  ;;  %v1681_v14 = vperm.slane %v1323_v39, %v3459_v18  ;;  %v1625_v43 = vperm.slane %v1294_v41, %v3534_v47 }
 0x24d   : > { %v1682_v10 = vsel %vm1549_vm10, %v1681_v14, %v1680_v22  ;;  %v1145_v35 = vpop.xlane.xlu1 %1144  ;;  %v1626_v5 = vsel %vm1561_vm13, %v1625_v43, %v1624_v34 }
 0x24e   : > { %v1175_v49 = vpop.xlane.xlu2 %1174  ;;  %v1324_v17 = vadd.f32 %v1145_v35, %v2868_v31 }
 0x250   : > { %v1233_v8 = vpop.xlane.xlu0 %1232  ;;  %v1683_v60 = vperm.slane %v1324_v17, %v3472_v1 }
 0x251   : > { %v1368_v54 = vadd.f32 %v1233_v8, %v2868_v31 }
 0x252   : > { %v1684_v7 = vsel %vm1553_vm11, %v1683_v60, %v1682_v10 }
 0x253   : > { %v1768_v12 = vperm.slane %v1368_v54, %v3368_v9 }
 0x255   : > { %v3615_v59 = vsel %vm1537_vm7, %v1768_v12, %v1767_v56  ;;  %v3617_v58 = vpop.xlane.xlu1 %1234 }
 0x256   : > { %v1087_v23 = vpop.xlane.xlu2 %1086 }
 0x257   : > { %v1295_v0 = vadd.f32 %v1087_v23, %v2868_v31 }
 0x258   : > { %v1115_v22 = vpop.xlane.xlu0 %1114 }
 0x259   : > { %v1627_v2 = vperm.slane %v1295_v0, %v3540_v21  ;;  %v1309_v56 = vadd.f32 %v1115_v22, %v2868_v31 }
 0x25b   : > { %v1628_v25 = vsel %vm1565_vm14, %v1627_v2, %v1626_v5  ;;  %v1654_v27 = vperm.slane %v1309_v56, %v3527_v29 }
 0x25c   : > { %v1787_v61 = vsel %vm1786_vm0, %v1628_v25, %v1785_v11 }
 0x25d   : > { %v1147_v9 = vpop.xlane.xlu1 %1146  ;;  %v1655_v24 = vsel %vm1557_vm12, %v1654_v27, %v1653_v46  ;;  %v1339_v46 = vadd.f32 %v1175_v49, %v2868_v31 }
 0x25e   : > { %v1177_v51 = vpop.xlane.xlu2 %1176  ;;  %v1325_v62 = vadd.f32 %v1147_v9, %v2868_v31 }
 0x25f   : > { %v1340_v15 = vadd.f32 %v1177_v51, %v2868_v31  ;;  %v1712_v39 = vperm.slane %v1339_v46, %v3459_v18 }
 0x260   : > { %v1205_v32 = vpop.xlane.xlu0 %1204  ;;  %v1685_v48 = vperm.slane %v1325_v62, %v3527_v29 }
 0x261   : > { %v1714_v14 = vperm.slane %v1340_v15, %v3472_v1  ;;  %v1713_v12 = vsel %vm1549_vm10, %v1712_v39, %v3598_v45  ;;  %v1354_v56 = vadd.f32 %v1205_v32, %v2868_v31 }
 0x262   : > { %v1686_v11 = vsel %vm1557_vm12, %v1685_v48, %v1684_v7 }
 0x263   : > { %v1715_v0 = vsel %vm1553_vm11, %v1714_v14, %v1713_v12  ;;  %v1741_v27 = vperm.slane %v1354_v56, %v3452_v28 }
 0x265   : > { %v3625_v50 = vpop.xlane.xlu1 %1236 }
 0x266   : > { %v1119_v52 = vpop.xlane.xlu2 %1118  ;;  %v1370_v32 = vadd.f32 %v3625_v50, %v2868_v31 }
 0x267   : > { %v1311_v30 = vadd.f32 %v1119_v52, %v2868_v31 }
 0x268   : > { %v1117_v4 = vpop.xlane.xlu0 %1116 }
 0x269   : > { %v1310_v42 = vadd.f32 %v1117_v4, %v2868_v31  ;;  %v1658_v16 = vperm.slane %v1311_v30, %v3540_v21 }
 0x26b   : > { %v1656_v19 = vperm.slane %v1310_v42, %v3534_v47 }
 0x26d   : > { %v1657_v6 = vsel %vm1561_vm13, %v1656_v19, %v1655_v24  ;;  %v1179_v34 = vpop.xlane.xlu1 %1178 }
 0x26e   : > { %v1659_v36 = vsel %vm1565_vm14, %v1658_v16, %v1657_v6  ;;  %v1209_v44 = vpop.xlane.xlu2 %1208  ;;  %v1341_v13 = vadd.f32 %v1179_v34, %v2868_v31  ;;  %v1369_v16 = vadd.f32 %v3617_v58, %v2868_v31  ;;  %v1742_v6 = vsel %vm1545_vm9, %v1741_v27, %v3601_v55 }
 0x26f   : > { %v1789_v20 = vsel %vm1788_vm1, %v1659_v36, %v1787_v61  ;;  %v1356_v19 = vadd.f32 %v1209_v44, %v2868_v31  ;;  %v1772_v55 = vperm.slane %v1370_v32, %v3452_v28 }
 0x270   : > { %v1207_v37 = vpop.xlane.xlu0 %1206  ;;  %v1716_v49 = vperm.slane %v1341_v13, %v3527_v29  ;;  %v1770_v58 = vperm.slane %v1369_v16, %v3447_v53 }
 0x271   : > { %v1355_v45 = vadd.f32 %v1207_v37, %v2868_v31  ;;  %v1745_v44 = vperm.slane %v1356_v19, %v3472_v1 }
 0x272   : > { %v1717_v2 = vsel %vm1557_vm12, %v1716_v49, %v1715_v0  ;;  %v1771_v28 = vsel %vm1541_vm8, %v1770_v58, %v3615_v59 }
 0x273   : > { %v1743_v4 = vperm.slane %v1355_v45, %v3459_v18  ;;  %v1773_v13 = vsel %vm1545_vm9, %v1772_v55, %v1771_v28 }
 0x275   : > { %v1151_v3 = vpop.xlane.xlu1 %1150  ;;  %v1744_v34 = vsel %vm1549_vm10, %v1743_v4, %v1742_v6 }
 0x276   : > { %v1181_v33 = vpop.xlane.xlu2 %1180  ;;  %v1327_v26 = vadd.f32 %v1151_v3, %v2868_v31  ;;  %v1746_v3 = vsel %vm1553_vm11, %v1745_v44, %v1744_v34 }
 0x277   : > { %v1342_v63 = vadd.f32 %v1181_v33, %v2868_v31 }
 0x278   : > { %v1149_v40 = vpop.xlane.xlu0 %1148  ;;  %v1689_v35 = vperm.slane %v1327_v26, %v3540_v21 }
 0x279   : > { %v1326_v38 = vadd.f32 %v1149_v40, %v2868_v31  ;;  %v1718_v54 = vperm.slane %v1342_v63, %v3534_v47 }
 0x27b   : > { %v1687_v57 = vperm.slane %v1326_v38, %v3534_v47  ;;  %v1719_v61 = vsel %vm1561_vm13, %v1718_v54, %v1717_v2 }
 0x27d   : > { %v1688_v8 = vsel %vm1561_vm13, %v1687_v57, %v1686_v11  ;;  %v1241_v5 = vpop.xlane.xlu1 %1240 }
 0x27e   : > { %v1690_v41 = vsel %vm1565_vm14, %v1689_v35, %v1688_v8  ;;  %v1183_v10 = vpop.xlane.xlu2 %1182  ;;  %v1372_v15 = vadd.f32 %v1241_v5, %v2868_v31 }
 0x27f   : > { %v1343_v43 = vadd.f32 %v1183_v10, %v2868_v31  ;;  %v1791_v23 = vsel %vm1790_vm2, %v1690_v41, %v1789_v20 }
 0x280   : > { %v1239_v22 = vpop.xlane.xlu0 %1238  ;;  %v1776_v57 = vperm.slane %v1372_v15, %v3472_v1 }
 0x281   : > { %v1720_v25 = vperm.slane %v1343_v43, %v3540_v21  ;;  %v1371_v36 = vadd.f32 %v1239_v22, %v2868_v31  ;;  %v1817_v22 = vpop.f32.mrf.mxu2 }
 0x283   : > { %v1721_v9 = vsel %vm1565_vm14, %v1720_v25, %v1719_v61  ;;  %v1774_v33 = vperm.slane %v1371_v36, %v3459_v18  ;;  %v2163_v25 = vld [vmem:[%s404_s25] ss:$0 sm:$0xff]  ;;  %s1887_s25 = scalar_lea.sflag [#allocation9], %s3712_s27 }
 0x284   : > { %v1793_v51 = vsel %vm1792_vm3, %v1721_v9, %v1791_v23 }
 0x285   : > { %v1243_v30 = vpop.xlane.xlu1 %1242  ;;  %v1775_v18 = vsel %vm1549_vm10, %v1774_v33, %v1773_v13 }
 0x286   : > { %v1215_v24 = vpop.xlane.xlu2 %1214  ;;  %v1373_v60 = vadd.f32 %v1243_v30, %v2868_v31  ;;  %v1777_v14 = vsel %vm1553_vm11, %v1776_v57, %v1775_v18 }
 0x287   : > { %v1359_v20 = vadd.f32 %v1215_v24, %v2868_v31 }
 0x288   : > { %v1211_v52 = vpop.xlane.xlu0 %1210  ;;  %v1778_v63 = vperm.slane %v1373_v60, %v3527_v29 }
 0x289   : > { %v1357_v42 = vadd.f32 %v1211_v52, %v2868_v31  ;;  %v1751_v46 = vperm.slane %v1359_v20, %v3540_v21 }
 0x28a   : > { %v1779_v35 = vsel %vm1557_vm12, %v1778_v63, %v1777_v14 }
 0x28b   : > { %v1747_v37 = vperm.slane %v1357_v42, %v3527_v29 }
 0x28d   : > { %v1748_v48 = vsel %vm1557_vm12, %v1747_v37, %v1746_v3  ;;  %v1247_v26 = vpop.xlane.xlu1 %1246 }
 0x28e   : > { %v1375_v7 = vadd.f32 %v1247_v26, %v2868_v31 }
 0x290   : > { %v1213_v17 = vpop.xlane.xlu0 %1212  ;;  %v1782_v49 = vperm.slane %v1375_v7, %v3540_v21 }
 0x291   : > { %v1358_v62 = vadd.f32 %v1213_v17, %v2868_v31 }
 0x293   : > { %v1749_v50 = vperm.slane %v1358_v62, %v3534_v47 }
 0x295   : > { %v1750_v53 = vsel %vm1561_vm13, %v1749_v50, %v1748_v48 }
 0x296   : > { %v1752_v40 = vsel %vm1565_vm14, %v1751_v46, %v1750_v53 }
 0x297   : > { %v1795_v38 = vsel %vm1794_vm4, %v1752_v40, %v1793_v51 }
 0x298   : > { %v1245_v39 = vpop.xlane.xlu0 %1244 }
 0x299   : > { %v1374_v11 = vadd.f32 %v1245_v39, %v2868_v31 }
 0x29b   : > { %v1780_v59 = vperm.slane %v1374_v11, %v3534_v47 }
 0x29d   : > { %v1781_v8 = vsel %vm1561_vm13, %v1780_v59, %v1779_v35 }
 0x29e   : > { %v1783_v29 = vsel %vm1565_vm14, %v1782_v49, %v1781_v8 }
 0x29f   : > { %v1797_v54 = vsel %vm1796_vm5, %v1783_v29, %v1795_v38 }
 0x2a0   : > { %v2058_v41 = vmul.f32 -1.442695, %v1797_v54 }
 0x2a2   : > { %2164 = vpow2.f32 %v2058_v41 }
 0x2a8   : > { %v2165_v10 = vpop.eup %2164 }
 0x2a9   : > { %v1824_v1 = vadd.f32 1.0, %v2165_v10 }
 0x2ab   : > { %2166 = vrcp.f32 %v1824_v1  ;;  %v1836_v47 = vand.u32 2147483648, %v1824_v1  ;;  %v1834_v0 = vand.u32 2147483647, %v1824_v1  ;;  %vm1830_vm7 = vweird.f32 %v1824_v1 }
 0x2ad   : > { %v1837_v2 = vor.u32 1.1754944e-38, %v1836_v47  ;;  %vm1835_vm9 = vcmp.eq.f32.partialorder %v1834_v0, 8.507059e+37 }
 0x2b1   : > { %v2167_v31 = vpop.eup %2166 }
 0x2b2   : > { %v1826_v12 = vmul.f32 %v2167_v31, %v1824_v1  ;;  %vm1831_vm6 = vweird.f32 %v2167_v31 }
 0x2b3   : > { %vm1832_vm8 = vmor %vm1830_vm7, %vm1831_vm6 }
 0x2b4   : > { %v1827_v43 = vsub.f32 1.0, %v1826_v12 }
 0x2b6   : > { %v1828_v23 = vmul.f32 %v2167_v31, %v1827_v43 }
 0x2b8   : > { %v1829_v21 = vadd.f32 %v2167_v31, %v1828_v23 }
 0x2ba   : > { %v1833_v5 = vsel %vm1832_vm8, %v2167_v31, %v1829_v21 }
 0x2bb   : > { %v1838_v61 = vsel %vm1835_vm9, %v1837_v2, %v1833_v5 }
 0x2bc   : > { %v1840_v9 = vmul.f32 %v1838_v61, %v1817_v22 }
 0x2be   : > { %v1845_v51 = vadd.f32 %v2163_v25, %v1840_v9 }
 0x2c0   : > { %1846 = vmax.xlane.f32.xlu2 %v1845_v51 }
 0x333   : > { %v1847_v56 = vpop.xlane.xlu2 %1846 }
 0x334   : > { %v1848_v45 = vsub.f32 %v1845_v51, %v1847_v56 }
 0x336   : > { %v1849_v52 = vmul.f32 0.17677669, %v1848_v45 }
 0x338   : > { %v1850_v27 = vmul.f32 1.442695, %v1849_v52 }
 0x33a   : > { %2168 = vpow2.f32 %v1850_v27 }
 0x340   : > { %v2169_v30 = vpop.eup %2168 }
 0x341   : > { %1852 = vadd.xlane.f32.xlu0 %v2169_v30 }
 0x3b4   : > { %v1853_v4 = vpop.xlane.xlu0 %1852 }
 0x3b5   : > { %2170 = vrcp.f32 %v1853_v4 }
 0x3bb   : > { %v2171_v42 = vpop.eup %2170 }
 0x3bc   : > { %v1855_v19 = vmul.f32 %v2171_v42, %v1853_v4 }
 0x3be   : > { %v1856_v24 = vsub.f32 2.0, %v1855_v19 }
 0x3c0   : > { %v1857_v16 = vmul.f32 %v2171_v42, %v1856_v24 }
 0x3c2   : > { %v1858_v6 = vmul.f32 %v2169_v30, %v1857_v16 }
 0x3c4   : > { %1876 = vmatmul.f32.vlgmr.msrb.gmra.mxu3 %v1858_v6  ;;  %1859 = vst [vmem:[%s388_s28] sm:$0xff] %v1858_v6 }
 0x3c5   : > { %2200 = shalt.err (!%p2197_p5)
}
 0x3c6   : > { %2102 = dma.vmem_to_hbm [thread:$0]  (%p2378_p4), %s1916_s21, 128, %s1918_s24, %s1887_s25  }
 0x3c7   : > { %s1898_s17 = scalar_lea.hbm %s3774_s8, %s2061_s30  ;;  %s381_s19 = scalar_lea.vmem [#allocation6], %s2052_s7 }
 0x3c8   : > { %s1900_s0 = sshll.u32 %s381_s19, 4  ;;  %s1902_s1 = sshll.u32 %s1898_s17, 4  ;;  %s1901_s0 = int_to_ptr.vmem [resolvable:$true] %s1900_s0  ;;  %s1903_s1 = int_to_ptr.hbm [resolvable:$true] %s1902_s1 }
 0x3c9   : > { %s1882_s2 = scalar_lea.sflag [#allocation7], %s3712_s27  ;;  %s2215_s3 = sshra.s32 %s1903_s1, 4  ;;  %s2216_s3 = int_to_ptr.hbm [resolvable:$true] %s2215_s3 }
 0x3ca   : > { %s2217_s26 = scalar_lea.hbm %s2216_s3, 8  ;;  %s2221_s25 = scalar_lea.hbm %s3774_s8, 16 }
 0x3cb   : > { %p2218_p6 = scmp.ne.s32.totalorder %s2216_s3, %s2217_s26  ;;  %p2222_p10 = scmp.lt.s32.totalorder %s2216_s3, %s3774_s8 }
 0x3cc   : > { %p2223_p11 = scmp.lt.s32.totalorder %s2221_s25, %s2217_s26 }
 0x3cd   : > { %p2219_p7 = pnand %p2218_p6, %p2378_p4 }
 0x3ce   : > { %p2224_p12 = por %p2223_p11, %p2222_p10 }
 0x3cf   : > { %p2220_p9 = pneg %p2219_p7 }
 0x3d1   : > { %p2225_p13 = pnand %p2224_p12, %p2220_p9 }
 0x447   : > { %v1877_v32 = vpop.f32.mrf.mxu3 }
 0x448   : > { %1880 = vst [vmem:[%s381_s19] sm:$0xff] %v1877_v32 }
 0x449   : > { %2228 = shalt.err (!%p2225_p13)
}
 0x44a   : > { %2101 = dma.vmem_to_hbm [thread:$0]  (%p2378_p4), %s1901_s0, 128, %s1903_s1, %s1882_s2  }
 0x44b PF: > { %p2112_p0 = scmp.ge.s32.totalorder %s2283_s16, 2  ;;  %s1929_s27 = sand.u32 1, %s2263_s11  }
 0x44c   : > { %s1930_s29 = scalar_lea.sflag [#allocation7], %s1929_s27 }
 0x44d   : > { %p2106_p1 = pnand %p2112_p0, %p2385_p8 }
 0x44f   : > { %p2107_p2 = pneg %p2106_p1 }
 0x451   : > { %2254 = dma.done.wait (%p2107_p2), %s1930_s29, 128  }
 0x452   : > { %2256 = vsyncadd (%p2107_p2), %s1930_s29, 4294967168  ;;  %s1940_s14 = scalar_lea.sflag [#allocation9], %s1929_s27 }
 0x453   : > { %2258 = dma.done.wait (%p2107_p2), %s1940_s14, 128  }
 0x454   : > { %2260 = vsyncadd (%p2107_p2), %s1940_s14, 4294967168  ;;  %s28_s16 = sadd.s32 1, %s2283_s16   ;;  %s3830_s11 = smov %s2267_s12 }
 0x455   : > { %p25_p3 = scmp.ge.s32.totalorder %s28_s16, 4   ;;  %s3831_s12 = smov %s2271_s13 }
 0x456   : > { %s3832_s13 = smov %s2391_s23  ;;  %s3833_s14 = smov %s2279_s15 }
 0x457   : > { %s3834_s15 = smov %s3836_s18  ;;  %27 = sbr.rel (!%p25_p3) target bundleno = 11 (0xb), region = 110 }
 0x45c   :  { %1946 = vsyncpa [#allocation7], 1 }
 0x45d   :  { %1948 = vsyncpa [#allocation7 + $0x1], 1 }
 0x45e   :  { %1949 = vsyncpa [#allocation9], 1 }
 0x45f   :  { %1951 = vsyncpa [#allocation9 + $0x1], 1 }

</bundles_post_ra>
